<compile_context>
chip_gen: v6e
topology: v6e:2x2x1
jax: 0.10.0
libtpu: 0.0.40
codegen_flags: <defaults>
</compile_context>

<pallas_src>
import jax
import jax.numpy as jnp
from jax import lax
from jax.experimental import pallas as pl
from jax.experimental.pallas import tpu as pltpu


def _sigmoid_via_tanh(x):
    # sigmoid(x) == 0.5 * (1 + tanh(x / 2)) : one EUP op instead of exp+recip.
    return 0.5 * (1.0 + jnp.tanh(0.5 * x))


def lstm_chunk_kernel(xw_ref, h0_ref, c0_ref, wh_ref,
                      hseq_ref, h_ref, c_ref):
    """Processes one (batch-shard, time-chunk) grid step.

    xw_ref   : (T, Bs, 4*Hp)  precomputed x_t @ W_x + bias (gate order i,f,o,g)
    h0_ref   : (Bs, Hp)       initial hidden state (this batch shard)
    c0_ref   : (Bs, Hp)       initial cell state
    wh_ref   : (Hp, 4*Hp)     fused recurrent weights
    hseq_ref : (T, Bs, Hp)    per-step hidden states (head applied outside)
    h_ref    : (Bs, Hp)       carried / final hidden state (constant over time axis)
    c_ref    : (Bs, Hp)       carried / final cell state
    """
    # First time chunk of each batch shard: load the carried state.
    @pl.when(pl.program_id(1) == 0)
    def _():
        h_ref[...] = h0_ref[...]
        c_ref[...] = c0_ref[...]

    Hp = wh_ref.shape[0]
    T = xw_ref.shape[0]
    wh = wh_ref[...]                 # loaded once per chunk
    mm_dtype = wh.dtype              # bf16 or f32 operands for the MXU

    def step(t, carry):
        h_prev, c_prev = carry       # f32 (Bs, Hp)
        # Single fused recurrent matmul per step: (Bs,Hp) x (Hp,4Hp) -> (Bs,4Hp).
        pre = (xw_ref[t].astype(jnp.float32)
               + jnp.dot(h_prev.astype(mm_dtype), wh,
                         preferred_element_type=jnp.float32))
        # Lane-aligned gate slices (Hp is a multiple of 128): i | f | o | g.
        sig = _sigmoid_via_tanh(pre[:, :3 * Hp])
        g_t = jnp.tanh(pre[:, 3 * Hp:])
        i_t = sig[:, 0 * Hp:1 * Hp]
        f_t = sig[:, 1 * Hp:2 * Hp]
        o_t = sig[:, 2 * Hp:3 * Hp]
        c_t = f_t * c_prev + i_t * g_t
        h_t = o_t * jnp.tanh(c_t)
        hseq_ref[t] = h_t.astype(hseq_ref.dtype)     # lane-dense (Bs, Hp=128k) store
        return (h_t, c_t)

    h_last, c_last = lax.fori_loop(0, T, step, (h_ref[...], c_ref[...]),
                                   unroll=min(T, 8))
    h_ref[...] = h_last
    c_ref[...] = c_last


def _vmem_capacity_bytes():
    try:
        cap = int(pltpu.get_tpu_info().vmem_capacity_bytes)
        if cap > 0:
            return cap
    except Exception:
        pass
    return 64 * 1024 * 1024   # conservative (v7x-sized) fallback


def lstm1_forward(x, params, initial_hidden_states=None, *,
                  use_bf16=False, time_chunk=None):
    """Mirrors LSTM1.forward: returns (hidden_seq (B,S,3), (h_t, c_t))."""
    B, S, I = x.shape
    H = params["X_i"].shape[1]

    Hp = ((H + 127) // 128) * 128            # lane-aligned hidden size
    Gp = 4 * Hp
    Bp = max(8, ((B + 7) // 8) * 8)          # sublane-aligned batch
    stream_dtype = jnp.bfloat16 if use_bf16 else jnp.float32

    # ---- Fuse + pad the per-gate weights (gate order i, f, o, g). ----
    def pad_x(w):   # (I,H) -> (I,Hp)
        return jnp.pad(w.astype(jnp.float32), ((0, 0), (0, Hp - H)))

    def pad_h(w):   # (H,H) -> (Hp,Hp)
        return jnp.pad(w.astype(jnp.float32), ((0, Hp - H), (0, Hp - H)))

    def pad_b(b):   # (H,) -> (Hp,)
        return jnp.pad(b.astype(jnp.float32), (0, Hp - H))

    gate_order = ("i", "f", "o", "g")
    w_x = jnp.concatenate([pad_x(params["X_" + g]) for g in gate_order], axis=1)   # (I, 4Hp)
    w_h = jnp.concatenate([pad_h(params["H_" + g]) for g in gate_order], axis=1)   # (Hp, 4Hp)
    bias = jnp.concatenate([pad_b(params["bias_" + g]) for g in gate_order])       # (4Hp,)

    # ---- Initial state, padded (padded lanes/rows stay exactly zero). ----
    if initial_hidden_states is None:
        h0 = jnp.zeros((B, H), jnp.float32)
        c0 = jnp.zeros((B, H), jnp.float32)
    else:
        h0, c0 = initial_hidden_states
    h0p = jnp.zeros((Bp, Hp), jnp.float32).at[:B, :H].set(h0.astype(jnp.float32))
    c0p = jnp.zeros((Bp, Hp), jnp.float32).at[:B, :H].set(c0.astype(jnp.float32))

    # ---- Hoisted input projection, time-major (S, Bp, 4Hp). ----
    xp = jnp.zeros((Bp, S, I), jnp.float32).at[:B].set(x.astype(jnp.float32))
    xw = (jnp.einsum("bsi,ig->sbg", xp, w_x) + bias[None, None, :]).astype(stream_dtype)
    w_h_k = w_h.astype(stream_dtype)

    # ---- Batch-parallel sharding (v7x megacore) + VMEM-aware time chunk. ----
    NB = 2 if (Bp >= 16 and Bp % 16 == 0) else 1
    Bs = Bp // NB

    item = jnp.dtype(stream_dtype).itemsize
    cap = _vmem_capacity_bytes()
    budget = (cap * 3) // 4
    per_t = 2 * Bs * (Gp + Hp) * item            # double-buffered xw in + hseq out
    fixed = Hp * Gp * item + 4 * Bs * Hp * 4     # W_h + h0/c0/h/c blocks
    if time_chunk is None:
        T = 1
        for d in range(1, min(S, 128) + 1):
            if S % d == 0 and fixed + d * per_t <= budget:
                T = d
    else:
        T = time_chunk
    assert S % T == 0, "time_chunk must divide the sequence length"
    need = fixed + T * per_t + (1 << 20)
    vmem_limit = int(min(cap, max(32 << 20, 2 * need)))

    grid = (NB, S // T)

    in_specs = [
        pl.BlockSpec((T, Bs, Gp), lambda b, c: (c, b, 0)),   # xw chunk
        pl.BlockSpec((Bs, Hp), lambda b, c: (b, 0)),         # h0 shard
        pl.BlockSpec((Bs, Hp), lambda b, c: (b, 0)),         # c0 shard
        pl.BlockSpec((Hp, Gp), lambda b, c: (0, 0)),         # fused W_h
    ]
    out_specs = [
        pl.BlockSpec((T, Bs, Hp), lambda b, c: (c, b, 0)),   # per-step h_t
        pl.BlockSpec((Bs, Hp), lambda b, c: (b, 0)),         # carried/final h
        pl.BlockSpec((Bs, Hp), lambda b, c: (b, 0)),         # carried/final c
    ]
    out_shape = (
        jax.ShapeDtypeStruct((S, Bp, Hp), stream_dtype),
        jax.ShapeDtypeStruct((Bp, Hp), jnp.float32),
        jax.ShapeDtypeStruct((Bp, Hp), jnp.float32),
    )

    h_seq, h_out, c_out = pl.pallas_call(
        lstm_chunk_kernel,
        out_shape=out_shape,
        grid_spec=pltpu.PrefetchScalarGridSpec(
            num_scalar_prefetch=0,
            grid=grid,
            in_specs=in_specs,
            out_specs=out_specs,
        ),
        compiler_params=pltpu.CompilerParams(
            dimension_semantics=("parallel", "arbitrary"),
            vmem_limit_bytes=vmem_limit),
    )(xw, h0p, c0p, w_h_k)

    # ---- Classification head + softmax, batched over all timesteps. ----
    h_seq = h_seq[:, :B, :H].astype(jnp.float32)             # (S, B, H)
    logits = (jnp.einsum("sbh,hc->bsc", h_seq, params["W_out"].astype(jnp.float32))
              + params["bias_out"][None, None, :])
    hidden_seq = jax.nn.softmax(logits, axis=-1)             # (B, S, 3)
    h_t = h_out[:B, :H]
    c_t = c_out[:B, :H]
    return hidden_seq, (h_t, c_t)


def lstm1_reference(x, params, initial_hidden_states=None):
    """Plain-JAX reference matching the PyTorch forward."""
    B, S, I = x.shape
    H = params["X_i"].shape[1]
    if initial_hidden_states is None:
        h_t = jnp.zeros((B, H), jnp.float32)
        c_t = jnp.zeros((B, H), jnp.float32)
    else:
        h_t, c_t = initial_hidden_states
    outs = []
    for t in range(S):
        x_t = x[:, t, :]
        i_t = jax.nn.sigmoid(x_t @ params["X_i"] + h_t @ params["H_i"] + params["bias_i"])
        f_t = jax.nn.sigmoid(x_t @ params["X_f"] + h_t @ params["H_f"] + params["bias_f"])
        g_t = jnp.tanh(x_t @ params["X_g"] + h_t @ params["H_g"] + params["bias_g"])
        o_t = jax.nn.sigmoid(x_t @ params["X_o"] + h_t @ params["H_o"] + params["bias_o"])
        c_t = f_t * c_t + i_t * g_t
        h_t = o_t * jnp.tanh(c_t)
        out = jax.nn.softmax(h_t @ params["W_out"] + params["bias_out"], axis=1)
        outs.append(out[None])
    hidden_seq = jnp.transpose(jnp.concatenate(outs, axis=0), (1, 0, 2))
    return hidden_seq, (h_t, c_t)


def init_params(key, input_sz, hidden_sz):
    names_shapes = [
        ("X_i", (input_sz, hidden_sz)), ("H_i", (hidden_sz, hidden_sz)), ("bias_i", (hidden_sz,)),
        ("X_f", (input_sz, hidden_sz)), ("H_f", (hidden_sz, hidden_sz)), ("bias_f", (hidden_sz,)),
        ("X_g", (input_sz, hidden_sz)), ("H_g", (hidden_sz, hidden_sz)), ("bias_g", (hidden_sz,)),
        ("X_o", (input_sz, hidden_sz)), ("H_o", (hidden_sz, hidden_sz)), ("bias_o", (hidden_sz,)),
        ("W_out", (hidden_sz, 3)), ("bias_out", (3,)),
    ]
    keys = jax.random.split(key, len(names_shapes))
    return {name: jax.random.normal(k, shape, dtype=jnp.float32)
            for (name, shape), k in zip(names_shapes, keys)}


if __name__ == "__main__":
    key = jax.random.PRNGKey(0)
    k_x, k_p = jax.random.split(key)

    batch, seq, input_sz, hidden_sz = 2, 8, 4, 32
    x = jax.random.normal(k_x, (batch, seq, input_sz), dtype=jnp.float32)
    params = init_params(k_p, input_sz, hidden_sz)

    ref_seq, (ref_h, ref_c) = lstm1_reference(x, params, initial_hidden_states=None)

    # f32 path (default): tight check against the reference.
    hidden_seq, (h_t, c_t) = lstm1_forward(x, params, initial_hidden_states=None)
    jax.block_until_ready((hidden_seq, h_t, c_t))
    assert hidden_seq.shape == (batch, seq, 3)
    assert h_t.shape == (batch, hidden_sz) and c_t.shape == (batch, hidden_sz)
    assert jnp.allclose(hidden_seq, ref_seq, atol=1e-4)
    assert jnp.allclose(h_t, ref_h, atol=1e-4)
    assert jnp.allclose(c_t, ref_c, atol=1e-4)

    # bf16-carried streams path (perf mode): runs and stays close to reference.
    seq_bf, (h_bf, c_bf) = lstm1_forward(x, params, initial_hidden_states=None,
                                         use_bf16=True)
    jax.block_until_ready((seq_bf, h_bf, c_bf))
    assert seq_bf.shape == (batch, seq, 3)
    assert bool(jnp.all(jnp.isfinite(seq_bf)))
    assert float(jnp.max(jnp.abs(seq_bf - ref_seq))) < 0.25

    print("KERNEL_OK")
</pallas_src>

<mosaic_0001>
module attributes {stable_mosaic.version = 11 : i64} {
  func.func @lstm_chunk_kernel(%arg0: i32, %arg1: i32, %arg2: memref<8x8x512xf32, #tpu.memory_space<vmem>>, %arg3: memref<8x128xf32, #tpu.memory_space<vmem>>, %arg4: memref<8x128xf32, #tpu.memory_space<vmem>>, %arg5: memref<128x512xf32, #tpu.memory_space<vmem>>, %arg6: memref<8x8x128xf32, #tpu.memory_space<vmem>>, %arg7: memref<8x128xf32, #tpu.memory_space<vmem>>, %arg8: memref<8x128xf32, #tpu.memory_space<vmem>>) attributes {dimension_semantics = [#tpu.dimension_semantics<parallel>, #tpu.dimension_semantics<arbitrary>], iteration_bounds = array<i64: 1, 1>, scalar_prefetch = 0 : i64, scratch_operands = 0 : i64, tpu.core_type = #tpu.core_type<tc>, window_params = [{transform_indices = @transform_0, window_bounds = array<i64: 8, 8, 512>}, {transform_indices = @transform_1, window_bounds = array<i64: 8, 128>}, {transform_indices = @transform_2, window_bounds = array<i64: 8, 128>}, {pipeline_mode = #tpu.pipeline_mode<synchronous>, transform_indices = @transform_3, window_bounds = array<i64: 128, 512>}, {transform_indices = @transform_4, window_bounds = array<i64: 8, 8, 128>}, {transform_indices = @transform_5, window_bounds = array<i64: 8, 128>}, {transform_indices = @transform_6, window_bounds = array<i64: 8, 128>}]} {
    %c0_i32 = arith.constant 0 : i32
    %0 = arith.cmpi eq, %arg1, %c0_i32 : i32
    %1 = arith.extui %0 : i1 to i32
    %c0_i32_0 = arith.constant 0 : i32
    %2 = arith.cmpi ne, %1, %c0_i32_0 : i32
    scf.if %2 {
      %c0_74 = arith.constant 0 : index
      %c0_75 = arith.constant 0 : index
      %224 = vector.load %arg3[%c0_74, %c0_75] : memref<8x128xf32, #tpu.memory_space<vmem>>, vector<8x128xf32>
      %c0_76 = arith.constant 0 : index
      %c0_77 = arith.constant 0 : index
      %225 = vector.load %arg7[%c0_76, %c0_77] : memref<8x128xf32, #tpu.memory_space<vmem>>, vector<8x128xf32>
      tpu.vector_store %arg7[%c0_76, %c0_77], %224 {strides = array<i32>} : memref<8x128xf32, #tpu.memory_space<vmem>>, vector<8x128xf32>,
      %c0_78 = arith.constant 0 : index
      %c0_79 = arith.constant 0 : index
      %226 = vector.load %arg4[%c0_78, %c0_79] : memref<8x128xf32, #tpu.memory_space<vmem>>, vector<8x128xf32>
      %c0_80 = arith.constant 0 : index
      %c0_81 = arith.constant 0 : index
      %227 = vector.load %arg8[%c0_80, %c0_81] : memref<8x128xf32, #tpu.memory_space<vmem>>, vector<8x128xf32>
      tpu.vector_store %arg8[%c0_80, %c0_81], %226 {strides = array<i32>} : memref<8x128xf32, #tpu.memory_space<vmem>>, vector<8x128xf32>,
    } else {
    }
    %c0 = arith.constant 0 : index
    %c0_1 = arith.constant 0 : index
    %3 = vector.load %arg5[%c0, %c0_1] : memref<128x512xf32, #tpu.memory_space<vmem>>, vector<128x512xf32>
    %c0_2 = arith.constant 0 : index
    %c0_3 = arith.constant 0 : index
    %4 = vector.load %arg7[%c0_2, %c0_3] : memref<8x128xf32, #tpu.memory_space<vmem>>, vector<8x128xf32>
    %c0_4 = arith.constant 0 : index
    %c0_5 = arith.constant 0 : index
    %5 = vector.load %arg8[%c0_4, %c0_5] : memref<8x128xf32, #tpu.memory_space<vmem>>, vector<8x128xf32>
    %c0_i32_6 = arith.constant 0 : i32
    %6 = arith.index_cast %c0_i32_6 : i32 to index
    %c0_7 = arith.constant 0 : index
    %c0_8 = arith.constant 0 : index
    %7 = vector.load %arg2[%6, %c0_7, %c0_8] : memref<8x8x512xf32, #tpu.memory_space<vmem>>, vector<1x8x512xf32>
    %8 = vector.shape_cast %7 : vector<1x8x512xf32> to vector<8x512xf32>
    %cst = arith.constant dense<0.000000e+00> : vector<8x512xf32>
    %9 = tpu.matmul %4, %3, %cst {dimension_numbers = #tpu.dot_dimension_numbers<[1], [0], [0], [1], [0, 0, 1, 1], [], []>} : vector<8x128xf32>, vector<128x512xf32>, vector<8x512xf32> -> vector<8x512xf32>
    %10 = arith.addf %8, %9 : vector<8x512xf32>
    %11 = vector.extract_strided_slice %10 {offsets = [0, 0], sizes = [8, 384], strides = [1, 1]} : vector<8x512xf32> to vector<8x384xf32>
    %cst_9 = arith.constant 5.000000e-01 : f32
    %12 = vector.broadcast %cst_9 : f32 to vector<8x384xf32>
    %13 = arith.mulf %12, %11 : vector<8x384xf32>
    %14 = math.tanh %13 : vector<8x384xf32>
    %cst_10 = arith.constant 1.000000e+00 : f32
    %15 = vector.broadcast %cst_10 : f32 to vector<8x384xf32>
    %16 = arith.addf %15, %14 : vector<8x384xf32>
    %cst_11 = arith.constant 5.000000e-01 : f32
    %17 = vector.broadcast %cst_11 : f32 to vector<8x384xf32>
    %18 = arith.mulf %17, %16 : vector<8x384xf32>
    %19 = vector.extract_strided_slice %10 {offsets = [0, 384], sizes = [8, 128], strides = [1, 1]} : vector<8x512xf32> to vector<8x128xf32>
    %20 = math.tanh %19 : vector<8x128xf32>
    %21 = vector.extract_strided_slice %18 {offsets = [0, 0], sizes = [8, 128], strides = [1, 1]} : vector<8x384xf32> to vector<8x128xf32>
    %22 = vector.extract_strided_slice %18 {offsets = [0, 128], sizes = [8, 128], strides = [1, 1]} : vector<8x384xf32> to vector<8x128xf32>
    %23 = vector.extract_strided_slice %18 {offsets = [0, 256], sizes = [8, 128], strides = [1, 1]} : vector<8x384xf32> to vector<8x128xf32>
    %24 = arith.mulf %22, %5 : vector<8x128xf32>
    %25 = arith.mulf %21, %20 : vector<8x128xf32>
    %26 = arith.addf %24, %25 : vector<8x128xf32>
    %27 = math.tanh %26 : vector<8x128xf32>
    %28 = arith.mulf %23, %27 : vector<8x128xf32>
    %29 = arith.index_cast %c0_i32_6 : i32 to index
    %c0_12 = arith.constant 0 : index
    %c0_13 = arith.constant 0 : index
    %30 = vector.load %arg6[%29, %c0_12, %c0_13] : memref<8x8x128xf32, #tpu.memory_space<vmem>>, vector<1x8x128xf32>
    %31 = vector.shape_cast %30 : vector<1x8x128xf32> to vector<8x128xf32>
    %32 = vector.shape_cast %28 : vector<8x128xf32> to vector<1x8x128xf32>
    tpu.vector_store %arg6[%29, %c0_12, %c0_13], %32 {strides = array<i32>} : memref<8x8x128xf32, #tpu.memory_space<vmem>>, vector<1x8x128xf32>,
    %c1_i32 = arith.constant 1 : i32
    %33 = arith.index_cast %c1_i32 : i32 to index
    %c0_14 = arith.constant 0 : index
    %c0_15 = arith.constant 0 : index
    %34 = vector.load %arg2[%33, %c0_14, %c0_15] : memref<8x8x512xf32, #tpu.memory_space<vmem>>, vector<1x8x512xf32>
    %35 = vector.shape_cast %34 : vector<1x8x512xf32> to vector<8x512xf32>
    %cst_16 = arith.constant dense<0.000000e+00> : vector<8x512xf32>
    %36 = tpu.matmul %28, %3, %cst_16 {dimension_numbers = #tpu.dot_dimension_numbers<[1], [0], [0], [1], [0, 0, 1, 1], [], []>} : vector<8x128xf32>, vector<128x512xf32>, vector<8x512xf32> -> vector<8x512xf32>
    %37 = arith.addf %35, %36 : vector<8x512xf32>
    %38 = vector.extract_strided_slice %37 {offsets = [0, 0], sizes = [8, 384], strides = [1, 1]} : vector<8x512xf32> to vector<8x384xf32>
    %cst_17 = arith.constant 5.000000e-01 : f32
    %39 = vector.broadcast %cst_17 : f32 to vector<8x384xf32>
    %40 = arith.mulf %39, %38 : vector<8x384xf32>
    %41 = math.tanh %40 : vector<8x384xf32>
    %cst_18 = arith.constant 1.000000e+00 : f32
    %42 = vector.broadcast %cst_18 : f32 to vector<8x384xf32>
    %43 = arith.addf %42, %41 : vector<8x384xf32>
    %cst_19 = arith.constant 5.000000e-01 : f32
    %44 = vector.broadcast %cst_19 : f32 to vector<8x384xf32>
    %45 = arith.mulf %44, %43 : vector<8x384xf32>
    %46 = vector.extract_strided_slice %37 {offsets = [0, 384], sizes = [8, 128], strides = [1, 1]} : vector<8x512xf32> to vector<8x128xf32>
    %47 = math.tanh %46 : vector<8x128xf32>
    %48 = vector.extract_strided_slice %45 {offsets = [0, 0], sizes = [8, 128], strides = [1, 1]} : vector<8x384xf32> to vector<8x128xf32>
    %49 = vector.extract_strided_slice %45 {offsets = [0, 128], sizes = [8, 128], strides = [1, 1]} : vector<8x384xf32> to vector<8x128xf32>
    %50 = vector.extract_strided_slice %45 {offsets = [0, 256], sizes = [8, 128], strides = [1, 1]} : vector<8x384xf32> to vector<8x128xf32>
    %51 = arith.mulf %49, %26 : vector<8x128xf32>
    %52 = arith.mulf %48, %47 : vector<8x128xf32>
    %53 = arith.addf %51, %52 : vector<8x128xf32>
    %54 = math.tanh %53 : vector<8x128xf32>
    %55 = arith.mulf %50, %54 : vector<8x128xf32>
    %56 = arith.index_cast %c1_i32 : i32 to index
    %c0_20 = arith.constant 0 : index
    %c0_21 = arith.constant 0 : index
    %57 = vector.load %arg6[%56, %c0_20, %c0_21] : memref<8x8x128xf32, #tpu.memory_space<vmem>>, vector<1x8x128xf32>
    %58 = vector.shape_cast %57 : vector<1x8x128xf32> to vector<8x128xf32>
    %59 = vector.shape_cast %55 : vector<8x128xf32> to vector<1x8x128xf32>
    tpu.vector_store %arg6[%56, %c0_20, %c0_21], %59 {strides = array<i32>} : memref<8x8x128xf32, #tpu.memory_space<vmem>>, vector<1x8x128xf32>,
    %c2_i32 = arith.constant 2 : i32
    %60 = arith.index_cast %c2_i32 : i32 to index
    %c0_22 = arith.constant 0 : index
    %c0_23 = arith.constant 0 : index
    %61 = vector.load %arg2[%60, %c0_22, %c0_23] : memref<8x8x512xf32, #tpu.memory_space<vmem>>, vector<1x8x512xf32>
    %62 = vector.shape_cast %61 : vector<1x8x512xf32> to vector<8x512xf32>
    %cst_24 = arith.constant dense<0.000000e+00> : vector<8x512xf32>
    %63 = tpu.matmul %55, %3, %cst_24 {dimension_numbers = #tpu.dot_dimension_numbers<[1], [0], [0], [1], [0, 0, 1, 1], [], []>} : vector<8x128xf32>, vector<128x512xf32>, vector<8x512xf32> -> vector<8x512xf32>
    %64 = arith.addf %62, %63 : vector<8x512xf32>
    %65 = vector.extract_strided_slice %64 {offsets = [0, 0], sizes = [8, 384], strides = [1, 1]} : vector<8x512xf32> to vector<8x384xf32>
    %cst_25 = arith.constant 5.000000e-01 : f32
    %66 = vector.broadcast %cst_25 : f32 to vector<8x384xf32>
    %67 = arith.mulf %66, %65 : vector<8x384xf32>
    %68 = math.tanh %67 : vector<8x384xf32>
    %cst_26 = arith.constant 1.000000e+00 : f32
    %69 = vector.broadcast %cst_26 : f32 to vector<8x384xf32>
    %70 = arith.addf %69, %68 : vector<8x384xf32>
    %cst_27 = arith.constant 5.000000e-01 : f32
    %71 = vector.broadcast %cst_27 : f32 to vector<8x384xf32>
    %72 = arith.mulf %71, %70 : vector<8x384xf32>
    %73 = vector.extract_strided_slice %64 {offsets = [0, 384], sizes = [8, 128], strides = [1, 1]} : vector<8x512xf32> to vector<8x128xf32>
    %74 = math.tanh %73 : vector<8x128xf32>
    %75 = vector.extract_strided_slice %72 {offsets = [0, 0], sizes = [8, 128], strides = [1, 1]} : vector<8x384xf32> to vector<8x128xf32>
    %76 = vector.extract_strided_slice %72 {offsets = [0, 128], sizes = [8, 128], strides = [1, 1]} : vector<8x384xf32> to vector<8x128xf32>
    %77 = vector.extract_strided_slice %72 {offsets = [0, 256], sizes = [8, 128], strides = [1, 1]} : vector<8x384xf32> to vector<8x128xf32>
    %78 = arith.mulf %76, %53 : vector<8x128xf32>
    %79 = arith.mulf %75, %74 : vector<8x128xf32>
    %80 = arith.addf %78, %79 : vector<8x128xf32>
    %81 = math.tanh %80 : vector<8x128xf32>
    %82 = arith.mulf %77, %81 : vector<8x128xf32>
    %83 = arith.index_cast %c2_i32 : i32 to index
    %c0_28 = arith.constant 0 : index
    %c0_29 = arith.constant 0 : index
    %84 = vector.load %arg6[%83, %c0_28, %c0_29] : memref<8x8x128xf32, #tpu.memory_space<vmem>>, vector<1x8x128xf32>
    %85 = vector.shape_cast %84 : vector<1x8x128xf32> to vector<8x128xf32>
    %86 = vector.shape_cast %82 : vector<8x128xf32> to vector<1x8x128xf32>
    tpu.vector_store %arg6[%83, %c0_28, %c0_29], %86 {strides = array<i32>} : memref<8x8x128xf32, #tpu.memory_space<vmem>>, vector<1x8x128xf32>,
    %c3_i32 = arith.constant 3 : i32
    %87 = arith.index_cast %c3_i32 : i32 to index
    %c0_30 = arith.constant 0 : index
    %c0_31 = arith.constant 0 : index
    %88 = vector.load %arg2[%87, %c0_30, %c0_31] : memref<8x8x512xf32, #tpu.memory_space<vmem>>, vector<1x8x512xf32>
    %89 = vector.shape_cast %88 : vector<1x8x512xf32> to vector<8x512xf32>
    %cst_32 = arith.constant dense<0.000000e+00> : vector<8x512xf32>
    %90 = tpu.matmul %82, %3, %cst_32 {dimension_numbers = #tpu.dot_dimension_numbers<[1], [0], [0], [1], [0, 0, 1, 1], [], []>} : vector<8x128xf32>, vector<128x512xf32>, vector<8x512xf32> -> vector<8x512xf32>
    %91 = arith.addf %89, %90 : vector<8x512xf32>
    %92 = vector.extract_strided_slice %91 {offsets = [0, 0], sizes = [8, 384], strides = [1, 1]} : vector<8x512xf32> to vector<8x384xf32>
    %cst_33 = arith.constant 5.000000e-01 : f32
    %93 = vector.broadcast %cst_33 : f32 to vector<8x384xf32>
    %94 = arith.mulf %93, %92 : vector<8x384xf32>
    %95 = math.tanh %94 : vector<8x384xf32>
    %cst_34 = arith.constant 1.000000e+00 : f32
    %96 = vector.broadcast %cst_34 : f32 to vector<8x384xf32>
    %97 = arith.addf %96, %95 : vector<8x384xf32>
    %cst_35 = arith.constant 5.000000e-01 : f32
    %98 = vector.broadcast %cst_35 : f32 to vector<8x384xf32>
    %99 = arith.mulf %98, %97 : vector<8x384xf32>
    %100 = vector.extract_strided_slice %91 {offsets = [0, 384], sizes = [8, 128], strides = [1, 1]} : vector<8x512xf32> to vector<8x128xf32>
    %101 = math.tanh %100 : vector<8x128xf32>
    %102 = vector.extract_strided_slice %99 {offsets = [0, 0], sizes = [8, 128], strides = [1, 1]} : vector<8x384xf32> to vector<8x128xf32>
    %103 = vector.extract_strided_slice %99 {offsets = [0, 128], sizes = [8, 128], strides = [1, 1]} : vector<8x384xf32> to vector<8x128xf32>
    %104 = vector.extract_strided_slice %99 {offsets = [0, 256], sizes = [8, 128], strides = [1, 1]} : vector<8x384xf32> to vector<8x128xf32>
    %105 = arith.mulf %103, %80 : vector<8x128xf32>
    %106 = arith.mulf %102, %101 : vector<8x128xf32>
    %107 = arith.addf %105, %106 : vector<8x128xf32>
    %108 = math.tanh %107 : vector<8x128xf32>
    %109 = arith.mulf %104, %108 : vector<8x128xf32>
    %110 = arith.index_cast %c3_i32 : i32 to index
    %c0_36 = arith.constant 0 : index
    %c0_37 = arith.constant 0 : index
    %111 = vector.load %arg6[%110, %c0_36, %c0_37] : memref<8x8x128xf32, #tpu.memory_space<vmem>>, vector<1x8x128xf32>
    %112 = vector.shape_cast %111 : vector<1x8x128xf32> to vector<8x128xf32>
    %113 = vector.shape_cast %109 : vector<8x128xf32> to vector<1x8x128xf32>
    tpu.vector_store %arg6[%110, %c0_36, %c0_37], %113 {strides = array<i32>} : memref<8x8x128xf32, #tpu.memory_space<vmem>>, vector<1x8x128xf32>,
    %c4_i32 = arith.constant 4 : i32
    %114 = arith.index_cast %c4_i32 : i32 to index
    %c0_38 = arith.constant 0 : index
    %c0_39 = arith.constant 0 : index
    %115 = vector.load %arg2[%114, %c0_38, %c0_39] : memref<8x8x512xf32, #tpu.memory_space<vmem>>, vector<1x8x512xf32>
    %116 = vector.shape_cast %115 : vector<1x8x512xf32> to vector<8x512xf32>
    %cst_40 = arith.constant dense<0.000000e+00> : vector<8x512xf32>
    %117 = tpu.matmul %109, %3, %cst_40 {dimension_numbers = #tpu.dot_dimension_numbers<[1], [0], [0], [1], [0, 0, 1, 1], [], []>} : vector<8x128xf32>, vector<128x512xf32>, vector<8x512xf32> -> vector<8x512xf32>
    %118 = arith.addf %116, %117 : vector<8x512xf32>
    %119 = vector.extract_strided_slice %118 {offsets = [0, 0], sizes = [8, 384], strides = [1, 1]} : vector<8x512xf32> to vector<8x384xf32>
    %cst_41 = arith.constant 5.000000e-01 : f32
    %120 = vector.broadcast %cst_41 : f32 to vector<8x384xf32>
    %121 = arith.mulf %120, %119 : vector<8x384xf32>
    %122 = math.tanh %121 : vector<8x384xf32>
    %cst_42 = arith.constant 1.000000e+00 : f32
    %123 = vector.broadcast %cst_42 : f32 to vector<8x384xf32>
    %124 = arith.addf %123, %122 : vector<8x384xf32>
    %cst_43 = arith.constant 5.000000e-01 : f32
    %125 = vector.broadcast %cst_43 : f32 to vector<8x384xf32>
    %126 = arith.mulf %125, %124 : vector<8x384xf32>
    %127 = vector.extract_strided_slice %118 {offsets = [0, 384], sizes = [8, 128], strides = [1, 1]} : vector<8x512xf32> to vector<8x128xf32>
    %128 = math.tanh %127 : vector<8x128xf32>
    %129 = vector.extract_strided_slice %126 {offsets = [0, 0], sizes = [8, 128], strides = [1, 1]} : vector<8x384xf32> to vector<8x128xf32>
    %130 = vector.extract_strided_slice %126 {offsets = [0, 128], sizes = [8, 128], strides = [1, 1]} : vector<8x384xf32> to vector<8x128xf32>
    %131 = vector.extract_strided_slice %126 {offsets = [0, 256], sizes = [8, 128], strides = [1, 1]} : vector<8x384xf32> to vector<8x128xf32>
    %132 = arith.mulf %130, %107 : vector<8x128xf32>
    %133 = arith.mulf %129, %128 : vector<8x128xf32>
    %134 = arith.addf %132, %133 : vector<8x128xf32>
    %135 = math.tanh %134 : vector<8x128xf32>
    %136 = arith.mulf %131, %135 : vector<8x128xf32>
    %137 = arith.index_cast %c4_i32 : i32 to index
    %c0_44 = arith.constant 0 : index
    %c0_45 = arith.constant 0 : index
    %138 = vector.load %arg6[%137, %c0_44, %c0_45] : memref<8x8x128xf32, #tpu.memory_space<vmem>>, vector<1x8x128xf32>
    %139 = vector.shape_cast %138 : vector<1x8x128xf32> to vector<8x128xf32>
    %140 = vector.shape_cast %136 : vector<8x128xf32> to vector<1x8x128xf32>
    tpu.vector_store %arg6[%137, %c0_44, %c0_45], %140 {strides = array<i32>} : memref<8x8x128xf32, #tpu.memory_space<vmem>>, vector<1x8x128xf32>,
    %c5_i32 = arith.constant 5 : i32
    %141 = arith.index_cast %c5_i32 : i32 to index
    %c0_46 = arith.constant 0 : index
    %c0_47 = arith.constant 0 : index
    %142 = vector.load %arg2[%141, %c0_46, %c0_47] : memref<8x8x512xf32, #tpu.memory_space<vmem>>, vector<1x8x512xf32>
    %143 = vector.shape_cast %142 : vector<1x8x512xf32> to vector<8x512xf32>
    %cst_48 = arith.constant dense<0.000000e+00> : vector<8x512xf32>
    %144 = tpu.matmul %136, %3, %cst_48 {dimension_numbers = #tpu.dot_dimension_numbers<[1], [0], [0], [1], [0, 0, 1, 1], [], []>} : vector<8x128xf32>, vector<128x512xf32>, vector<8x512xf32> -> vector<8x512xf32>
    %145 = arith.addf %143, %144 : vector<8x512xf32>
    %146 = vector.extract_strided_slice %145 {offsets = [0, 0], sizes = [8, 384], strides = [1, 1]} : vector<8x512xf32> to vector<8x384xf32>
    %cst_49 = arith.constant 5.000000e-01 : f32
    %147 = vector.broadcast %cst_49 : f32 to vector<8x384xf32>
    %148 = arith.mulf %147, %146 : vector<8x384xf32>
    %149 = math.tanh %148 : vector<8x384xf32>
    %cst_50 = arith.constant 1.000000e+00 : f32
    %150 = vector.broadcast %cst_50 : f32 to vector<8x384xf32>
    %151 = arith.addf %150, %149 : vector<8x384xf32>
    %cst_51 = arith.constant 5.000000e-01 : f32
    %152 = vector.broadcast %cst_51 : f32 to vector<8x384xf32>
    %153 = arith.mulf %152, %151 : vector<8x384xf32>
    %154 = vector.extract_strided_slice %145 {offsets = [0, 384], sizes = [8, 128], strides = [1, 1]} : vector<8x512xf32> to vector<8x128xf32>
    %155 = math.tanh %154 : vector<8x128xf32>
    %156 = vector.extract_strided_slice %153 {offsets = [0, 0], sizes = [8, 128], strides = [1, 1]} : vector<8x384xf32> to vector<8x128xf32>
    %157 = vector.extract_strided_slice %153 {offsets = [0, 128], sizes = [8, 128], strides = [1, 1]} : vector<8x384xf32> to vector<8x128xf32>
    %158 = vector.extract_strided_slice %153 {offsets = [0, 256], sizes = [8, 128], strides = [1, 1]} : vector<8x384xf32> to vector<8x128xf32>
    %159 = arith.mulf %157, %134 : vector<8x128xf32>
    %160 = arith.mulf %156, %155 : vector<8x128xf32>
    %161 = arith.addf %159, %160 : vector<8x128xf32>
    %162 = math.tanh %161 : vector<8x128xf32>
    %163 = arith.mulf %158, %162 : vector<8x128xf32>
    %164 = arith.index_cast %c5_i32 : i32 to index
    %c0_52 = arith.constant 0 : index
    %c0_53 = arith.constant 0 : index
    %165 = vector.load %arg6[%164, %c0_52, %c0_53] : memref<8x8x128xf32, #tpu.memory_space<vmem>>, vector<1x8x128xf32>
    %166 = vector.shape_cast %165 : vector<1x8x128xf32> to vector<8x128xf32>
    %167 = vector.shape_cast %163 : vector<8x128xf32> to vector<1x8x128xf32>
    tpu.vector_store %arg6[%164, %c0_52, %c0_53], %167 {strides = array<i32>} : memref<8x8x128xf32, #tpu.memory_space<vmem>>, vector<1x8x128xf32>,
    %c6_i32 = arith.constant 6 : i32
    %168 = arith.index_cast %c6_i32 : i32 to index
    %c0_54 = arith.constant 0 : index
    %c0_55 = arith.constant 0 : index
    %169 = vector.load %arg2[%168, %c0_54, %c0_55] : memref<8x8x512xf32, #tpu.memory_space<vmem>>, vector<1x8x512xf32>
    %170 = vector.shape_cast %169 : vector<1x8x512xf32> to vector<8x512xf32>
    %cst_56 = arith.constant dense<0.000000e+00> : vector<8x512xf32>
    %171 = tpu.matmul %163, %3, %cst_56 {dimension_numbers = #tpu.dot_dimension_numbers<[1], [0], [0], [1], [0, 0, 1, 1], [], []>} : vector<8x128xf32>, vector<128x512xf32>, vector<8x512xf32> -> vector<8x512xf32>
    %172 = arith.addf %170, %171 : vector<8x512xf32>
    %173 = vector.extract_strided_slice %172 {offsets = [0, 0], sizes = [8, 384], strides = [1, 1]} : vector<8x512xf32> to vector<8x384xf32>
    %cst_57 = arith.constant 5.000000e-01 : f32
    %174 = vector.broadcast %cst_57 : f32 to vector<8x384xf32>
    %175 = arith.mulf %174, %173 : vector<8x384xf32>
    %176 = math.tanh %175 : vector<8x384xf32>
    %cst_58 = arith.constant 1.000000e+00 : f32
    %177 = vector.broadcast %cst_58 : f32 to vector<8x384xf32>
    %178 = arith.addf %177, %176 : vector<8x384xf32>
    %cst_59 = arith.constant 5.000000e-01 : f32
    %179 = vector.broadcast %cst_59 : f32 to vector<8x384xf32>
    %180 = arith.mulf %179, %178 : vector<8x384xf32>
    %181 = vector.extract_strided_slice %172 {offsets = [0, 384], sizes = [8, 128], strides = [1, 1]} : vector<8x512xf32> to vector<8x128xf32>
    %182 = math.tanh %181 : vector<8x128xf32>
    %183 = vector.extract_strided_slice %180 {offsets = [0, 0], sizes = [8, 128], strides = [1, 1]} : vector<8x384xf32> to vector<8x128xf32>
    %184 = vector.extract_strided_slice %180 {offsets = [0, 128], sizes = [8, 128], strides = [1, 1]} : vector<8x384xf32> to vector<8x128xf32>
    %185 = vector.extract_strided_slice %180 {offsets = [0, 256], sizes = [8, 128], strides = [1, 1]} : vector<8x384xf32> to vector<8x128xf32>
    %186 = arith.mulf %184, %161 : vector<8x128xf32>
    %187 = arith.mulf %183, %182 : vector<8x128xf32>
    %188 = arith.addf %186, %187 : vector<8x128xf32>
    %189 = math.tanh %188 : vector<8x128xf32>
    %190 = arith.mulf %185, %189 : vector<8x128xf32>
    %191 = arith.index_cast %c6_i32 : i32 to index
    %c0_60 = arith.constant 0 : index
    %c0_61 = arith.constant 0 : index
    %192 = vector.load %arg6[%191, %c0_60, %c0_61] : memref<8x8x128xf32, #tpu.memory_space<vmem>>, vector<1x8x128xf32>
    %193 = vector.shape_cast %192 : vector<1x8x128xf32> to vector<8x128xf32>
    %194 = vector.shape_cast %190 : vector<8x128xf32> to vector<1x8x128xf32>
    tpu.vector_store %arg6[%191, %c0_60, %c0_61], %194 {strides = array<i32>} : memref<8x8x128xf32, #tpu.memory_space<vmem>>, vector<1x8x128xf32>,
    %c7_i32 = arith.constant 7 : i32
    %195 = arith.index_cast %c7_i32 : i32 to index
    %c0_62 = arith.constant 0 : index
    %c0_63 = arith.constant 0 : index
    %196 = vector.load %arg2[%195, %c0_62, %c0_63] : memref<8x8x512xf32, #tpu.memory_space<vmem>>, vector<1x8x512xf32>
    %197 = vector.shape_cast %196 : vector<1x8x512xf32> to vector<8x512xf32>
    %cst_64 = arith.constant dense<0.000000e+00> : vector<8x512xf32>
    %198 = tpu.matmul %190, %3, %cst_64 {dimension_numbers = #tpu.dot_dimension_numbers<[1], [0], [0], [1], [0, 0, 1, 1], [], []>} : vector<8x128xf32>, vector<128x512xf32>, vector<8x512xf32> -> vector<8x512xf32>
    %199 = arith.addf %197, %198 : vector<8x512xf32>
    %200 = vector.extract_strided_slice %199 {offsets = [0, 0], sizes = [8, 384], strides = [1, 1]} : vector<8x512xf32> to vector<8x384xf32>
    %cst_65 = arith.constant 5.000000e-01 : f32
    %201 = vector.broadcast %cst_65 : f32 to vector<8x384xf32>
    %202 = arith.mulf %201, %200 : vector<8x384xf32>
    %203 = math.tanh %202 : vector<8x384xf32>
    %cst_66 = arith.constant 1.000000e+00 : f32
    %204 = vector.broadcast %cst_66 : f32 to vector<8x384xf32>
    %205 = arith.addf %204, %203 : vector<8x384xf32>
    %cst_67 = arith.constant 5.000000e-01 : f32
    %206 = vector.broadcast %cst_67 : f32 to vector<8x384xf32>
    %207 = arith.mulf %206, %205 : vector<8x384xf32>
    %208 = vector.extract_strided_slice %199 {offsets = [0, 384], sizes = [8, 128], strides = [1, 1]} : vector<8x512xf32> to vector<8x128xf32>
    %209 = math.tanh %208 : vector<8x128xf32>
    %210 = vector.extract_strided_slice %207 {offsets = [0, 0], sizes = [8, 128], strides = [1, 1]} : vector<8x384xf32> to vector<8x128xf32>
    %211 = vector.extract_strided_slice %207 {offsets = [0, 128], sizes = [8, 128], strides = [1, 1]} : vector<8x384xf32> to vector<8x128xf32>
    %212 = vector.extract_strided_slice %207 {offsets = [0, 256], sizes = [8, 128], strides = [1, 1]} : vector<8x384xf32> to vector<8x128xf32>
    %213 = arith.mulf %211, %188 : vector<8x128xf32>
    %214 = arith.mulf %210, %209 : vector<8x128xf32>
    %215 = arith.addf %213, %214 : vector<8x128xf32>
    %216 = math.tanh %215 : vector<8x128xf32>
    %217 = arith.mulf %212, %216 : vector<8x128xf32>
    %218 = arith.index_cast %c7_i32 : i32 to index
    %c0_68 = arith.constant 0 : index
    %c0_69 = arith.constant 0 : index
    %219 = vector.load %arg6[%218, %c0_68, %c0_69] : memref<8x8x128xf32, #tpu.memory_space<vmem>>, vector<1x8x128xf32>
    %220 = vector.shape_cast %219 : vector<1x8x128xf32> to vector<8x128xf32>
    %221 = vector.shape_cast %217 : vector<8x128xf32> to vector<1x8x128xf32>
    tpu.vector_store %arg6[%218, %c0_68, %c0_69], %221 {strides = array<i32>} : memref<8x8x128xf32, #tpu.memory_space<vmem>>, vector<1x8x128xf32>,
    %c8_i32 = arith.constant 8 : i32
    %c0_70 = arith.constant 0 : index
    %c0_71 = arith.constant 0 : index
    %222 = vector.load %arg7[%c0_70, %c0_71] : memref<8x128xf32, #tpu.memory_space<vmem>>, vector<8x128xf32>
    tpu.vector_store %arg7[%c0_70, %c0_71], %217 {strides = array<i32>} : memref<8x128xf32, #tpu.memory_space<vmem>>, vector<8x128xf32>,
    %c0_72 = arith.constant 0 : index
    %c0_73 = arith.constant 0 : index
    %223 = vector.load %arg8[%c0_72, %c0_73] : memref<8x128xf32, #tpu.memory_space<vmem>>, vector<8x128xf32>
    tpu.vector_store %arg8[%c0_72, %c0_73], %215 {strides = array<i32>} : memref<8x128xf32, #tpu.memory_space<vmem>>, vector<8x128xf32>,
    return
  }
  func.func @transform_0(%arg0: i32, %arg1: i32) -> (i32, i32, i32) {
    %c0_i32 = arith.constant 0 : i32
    %c0_i32_0 = arith.constant 0 : i32
    return %arg1, %arg0, %c0_i32 : i32, i32, i32
  }
  func.func @transform_1(%arg0: i32, %arg1: i32) -> (i32, i32) {
    %c0_i32 = arith.constant 0 : i32
    %c0_i32_0 = arith.constant 0 : i32
    return %arg0, %c0_i32 : i32, i32
  }
  func.func @transform_2(%arg0: i32, %arg1: i32) -> (i32, i32) {
    %c0_i32 = arith.constant 0 : i32
    %c0_i32_0 = arith.constant 0 : i32
    return %arg0, %c0_i32 : i32, i32
  }
  func.func @transform_3(%arg0: i32, %arg1: i32) -> (i32, i32) {
    %c0_i32 = arith.constant 0 : i32
    %c0_i32_0 = arith.constant 0 : i32
    %c0_i32_1 = arith.constant 0 : i32
    return %c0_i32, %c0_i32_0 : i32, i32
  }
  func.func @transform_4(%arg0: i32, %arg1: i32) -> (i32, i32, i32) {
    %c0_i32 = arith.constant 0 : i32
    %c0_i32_0 = arith.constant 0 : i32
    return %arg1, %arg0, %c0_i32 : i32, i32, i32
  }
  func.func @transform_5(%arg0: i32, %arg1: i32) -> (i32, i32) {
    %c0_i32 = arith.constant 0 : i32
    %c0_i32_0 = arith.constant 0 : i32
    return %arg0, %c0_i32 : i32, i32
  }
  func.func @transform_6(%arg0: i32, %arg1: i32) -> (i32, i32) {
    %c0_i32 = arith.constant 0 : i32
    %c0_i32_0 = arith.constant 0 : i32
    return %arg0, %c0_i32 : i32, i32
  }
}

</mosaic_0001>

<bundles_post_ra>
// kernel: tpu_custom_call.1
= control target key start
LH: loop header
LB: loop body
LE: loop exit
PB: predicated region body
PF: predicated region fallthrough
CT: control target
= control target key end

     0   :  { %12 = vsyncpa [#allocation3], 0  ;;  %s2743_s0 = inlined_call_operand.hbm [shape: f32[8,8,512], index: 0, kind: input, shape index: {}]   ;;  %s2744_s1 = inlined_call_operand.hbm [shape: f32[8,128], index: 1, kind: input, shape index: {}]   ;;  %s2745_s2 = inlined_call_operand.hbm [shape: f32[8,128], index: 2, kind: input, shape index: {}]   ;;  %s2746_s3 = inlined_call_operand.hbm [shape: f32[128,512], index: 3, kind: input, shape index: {}]   ;;  %s2747_s4 = inlined_call_operand.hbm [shape: f32[8,8,128], index: 4, kind: output, shape index: {0}]   ;;  %s2748_s5 = inlined_call_operand.hbm [shape: f32[8,128], index: 5, kind: output, shape index: {1}]   ;;  %s2749_s6 = inlined_call_operand.hbm [shape: f32[8,128], index: 6, kind: output, shape index: {2}]  }
   0x1   :  { %13 = vsyncpa [#allocation6], 0 }
   0x2   :  { %14 = vsyncpa [#allocation9], 0 }
   0x3   :  { %15 = vsyncpa [#allocation4], 0 }
   0x4   :  { %16 = vsyncpa [#allocation12], 0  ;;  %s1867_s21 = smov [#allocation5]   ;;  %s1868_s23 = smov [#allocation2]  }
   0x5   :  { %s35_s22 = sshll.u32 %s1867_s21, 4  ;;  %s22_s24 = sshll.u32 %s1868_s23, 4  ;;  %s36_s22 = int_to_ptr.vmem [resolvable:$true] %s35_s22  ;;  %s23_s24 = int_to_ptr.vmem [resolvable:$true] %s22_s24 }
   0x6   :  { %s1725_s25 = scalar_lea.vmem %s36_s22, 128  ;;  %p1730_p1 = scmp.lt.s32.totalorder %s36_s22, %s36_s22 }
   0x7   :  { %p1726_p0 = scmp.ne.s32.totalorder %s36_s22, %s1725_s25  ;;  %p1731_p2 = scmp.lt.s32.totalorder %s1725_s25, %s1725_s25 }
   0x9   :  { %p1732_p3 = por %p1731_p2, %p1730_p1 }
   0xb   :  { %p1733_p4 = pnand %p1732_p3, %p1726_p0 }
   0xd   :  { %1736 = shalt.err (!%p1733_p4)
}
   0xe   :  { %38 = dma.hbm_to_vmem [thread:$0]  %s2744_s1, 128, %s36_s22, [#allocation6]  }
   0xf   :  { %s1745_s28 = scalar_lea.vmem %s23_s24, 4096  ;;  %p1750_p6 = scmp.lt.s32.totalorder %s23_s24, %s23_s24 }
  0x10   :  { %p1746_p5 = scmp.ne.s32.totalorder %s23_s24, %s1745_s28  ;;  %p1751_p7 = scmp.lt.s32.totalorder %s1745_s28, %s1745_s28 }
  0x12   :  { %p1752_p8 = por %p1751_p7, %p1750_p6 }
  0x14   :  { %p1753_p9 = pnand %p1752_p8, %p1746_p5 }
  0x16   :  { %1756 = shalt.err (!%p1753_p9)
}
  0x17   :  { %s1869_s29 = smov 512   ;;  %s1870_s30 = smov 32  }
  0x18   :  { %28 = dma.hbm_to_vmem [thread:$0]  %s2743_s0, 4096, %s23_s24, [#allocation3], %s1869_s29, %s1869_s29, %s1870_s30  }
  0x19   :  { %s1871_s9 = smov [#allocation7]   ;;  %s1872_s11 = smov [#allocation8]  }
  0x1a   :  { %s45_s10 = sshll.u32 %s1871_s9, 4  ;;  %s54_s12 = sshll.u32 %s1872_s11, 4  ;;  %s46_s10 = int_to_ptr.vmem [resolvable:$true] %s45_s10  ;;  %s55_s12 = int_to_ptr.vmem [resolvable:$true] %s54_s12 }
  0x1b   :  { %s1765_s1 = scalar_lea.vmem %s46_s10, 128  ;;  %p1770_p11 = scmp.lt.s32.totalorder %s46_s10, %s46_s10 }
  0x1c   :  { %p1766_p10 = scmp.ne.s32.totalorder %s46_s10, %s1765_s1  ;;  %p1771_p12 = scmp.lt.s32.totalorder %s1765_s1, %s1765_s1 }
  0x1e   :  { %p1772_p13 = por %p1771_p12, %p1770_p11 }
  0x20   :  { %p1773_p0 = pnand %p1772_p13, %p1766_p10 }
  0x22   :  { %1776 = shalt.err (!%p1773_p0)
}
  0x23   :  { %48 = dma.hbm_to_vmem [thread:$0]  %s2745_s2, 128, %s46_s10, [#allocation6]  }
  0x24   :  { %s1785_s15 = scalar_lea.vmem %s55_s12, 8192  ;;  %p1790_p2 = scmp.lt.s32.totalorder %s55_s12, %s55_s12 }
  0x25   :  { %p1786_p1 = scmp.ne.s32.totalorder %s55_s12, %s1785_s15  ;;  %p1791_p3 = scmp.lt.s32.totalorder %s1785_s15, %s1785_s15 }
  0x27   :  { %p1792_p4 = por %p1791_p3, %p1790_p2 }
  0x29   :  { %p1793_p5 = pnand %p1792_p4, %p1786_p1 }
  0x2b   :  { %1796 = shalt.err (!%p1793_p5)
}
  0x2c   :  { %60 = dma.hbm_to_vmem [thread:$0]  %s2746_s3, 8192, %s55_s12, [#allocation9], %s1869_s29, %s1869_s29, %s1870_s30  }
  0x2d   :  { %1857 = dma.done.wait [#allocation3], 4096  }
  0x2e   :  { %1858 = vsyncadd [#allocation3], 4294963200 }
  0x2f   :  { %1859 = dma.done.wait [#allocation6], 256  }
  0x30   :  { %1860 = vsyncadd [#allocation6], 4294967040 }
  0x31   :  { %1861 = dma.done.wait [#allocation9], 8192  }
  0x32   :  { %1862 = vsyncadd [#allocation9], 4294959104  ;;  %v2750_v0 = vmov 0.0   ;;  %v1928_v1 = vld [vmem:[#allocation8 + $0x1e8] sm:$0xff]  ;;  %v1930_v2 = vld [vmem:[#allocation8 + $0x1e0] sm:$0xff]  ;;  %s1874_s2 = smov [#allocation11]  }
  0x33   :  { %215 = vmatprep.mubr.f32.mxu0 %v2750_v0  ;;  %286 = vmatprep.mubr.f32.mxu1 %v2750_v0  ;;  %2817 = vst [vmem:[#allocation19_spill] sm:$0xff] %v1928_v1  ;;  %v1932_v3 = vld [vmem:[#allocation8 + $0x1c8] sm:$0xff]  ;;  %v1935_v4 = vld [vmem:[#allocation8 + $0x1c0] sm:$0xff]  ;;  %v1937_v5 = vld [vmem:[#allocation8 + $0x1f8] sm:$0xff]  ;;  %s1533_s3 = sshll.u32 %s1874_s2, 4  ;;  %s1875_s17 = smov [#allocation10]   ;;  %s1534_s3 = int_to_ptr.vmem [resolvable:$true] %s1533_s3 }
  0x34   :  { %151 = vmatprep.subr.mxu0 %v1928_v1  ;;  %2818 = vst [vmem:[#allocation20_spill] sm:$0xff] %v1937_v5  ;;  %v1940_v6 = vld [vmem:[#allocation8 + $0x1a8] sm:$0xff]  ;;  %222 = vmatprep.subr.mxu1 %v1937_v5  ;;  %v1943_v7 = vld [vmem:[#allocation8 + $0x1f0] sm:$0xff]  ;;  %v1946_v8 = vld [vmem:[#allocation8 + $0x1a0] sm:$0xff]  ;;  %s1520_s18 = sshll.u32 %s1875_s17, 4  ;;  %s1876_s19 = smov [#allocation13]   ;;  %s1521_s18 = int_to_ptr.vmem [resolvable:$true] %s1520_s18 }
  0x35   :  { %152 = vmatpush1.msra.mxu0 %v1930_v2  ;;  %223 = vmatpush1.msra.mxu1 %v1943_v7  ;;  %v1949_v9 = vld [vmem:[#allocation8 + $0x1d8] sm:$0xff]  ;;  %v1951_v10 = vld [vmem:[#allocation8 + $0x1d0] sm:$0xff]  ;;  %v1954_v11 = vld [vmem:[#allocation8 + $0x188] sm:$0xff]  ;;  %s1543_s20 = sshll.u32 %s1876_s19, 4  ;;  %s1797_s21 = scalar_lea.vmem %s1534_s3, 128  ;;  %s1544_s20 = int_to_ptr.vmem [resolvable:$true] %s1543_s20 }
  0x36   :  { %153 = vmatprep.subr.mxu0 %v1932_v3  ;;  %224 = vmatprep.subr.mxu1 %v1949_v9  ;;  %v1957_v12 = vld [vmem:[#allocation8 + $0x1b8] sm:$0xff]  ;;  %v1960_v13 = vld [vmem:[#allocation8 + $0x180] sm:$0xff]  ;;  %v1963_v14 = vld [vmem:[#allocation8 + $0x1b0] sm:$0xff]  ;;  %p1798_p6 = scmp.ne.s32.totalorder %s1534_s3, %s1797_s21  ;;  %p1802_p7 = scmp.lt.s32.totalorder %s1534_s3, %s1534_s3 }
  0x37   :  { %154 = vmatpush1.msra.mxu0 %v1935_v4  ;;  %225 = vmatpush1.msra.mxu1 %v1951_v10  ;;  %v1965_v15 = vld [vmem:[#allocation8 + $0x198] sm:$0xff]  ;;  %v1968_v16 = vld [vmem:[#allocation8 + $0x168] sm:$0xff]  ;;  %v1971_v17 = vld [vmem:[#allocation8 + $0x190] sm:$0xff]  ;;  %p1803_p8 = scmp.lt.s32.totalorder %s1797_s21, %s1797_s21 }
  0x38   :  { %155 = vmatprep.subr.mxu0 %v1940_v6  ;;  %226 = vmatprep.subr.mxu1 %v1957_v12  ;;  %v1974_v18 = vld [vmem:[#allocation8 + $0x160] sm:$0xff]  ;;  %v1977_v19 = vld [vmem:[#allocation8 + $0x178] sm:$0xff]  ;;  %v1980_v20 = vld [vmem:[#allocation8 + $0x148] sm:$0xff] }
  0x39   :  { %156 = vmatpush1.msra.mxu0 %v1946_v8  ;;  %227 = vmatpush1.msra.mxu1 %v1963_v14  ;;  %v1983_v21 = vld [vmem:[#allocation8 + $0x170] sm:$0xff]  ;;  %v1986_v22 = vld [vmem:[#allocation8 + $0x140] sm:$0xff]  ;;  %v1989_v23 = vld [vmem:[#allocation8 + $0x158] sm:$0xff]  ;;  %p1804_p9 = por %p1803_p8, %p1802_p7 }
  0x3a   :  { %157 = vmatprep.subr.mxu0 %v1954_v11  ;;  %228 = vmatprep.subr.mxu1 %v1965_v15  ;;  %v1992_v24 = vld [vmem:[#allocation8 + $0x128] sm:$0xff]  ;;  %v1995_v25 = vld [vmem:[#allocation8 + $0x150] sm:$0xff]  ;;  %v1998_v26 = vld [vmem:[#allocation8 + $0x120] sm:$0xff] }
  0x3b   :  { %158 = vmatpush1.msra.mxu0 %v1960_v13  ;;  %229 = vmatpush1.msra.mxu1 %v1971_v17  ;;  %v2001_v27 = vld [vmem:[#allocation8 + $0x138] sm:$0xff]  ;;  %v2004_v28 = vld [vmem:[#allocation8 + $0x108] sm:$0xff]  ;;  %v2007_v29 = vld [vmem:[#allocation8 + $0x130] sm:$0xff]  ;;  %p1805_p10 = pnand %p1804_p9, %p1798_p6 }
  0x3c   :  { %159 = vmatprep.subr.mxu0 %v1968_v16  ;;  %230 = vmatprep.subr.mxu1 %v1977_v19  ;;  %v2010_v30 = vld [vmem:[#allocation8 + $0x100] sm:$0xff]  ;;  %v2013_v31 = vld [vmem:[#allocation8 + $0x118] sm:$0xff]  ;;  %v2016_v32 = vld [vmem:[#allocation8 + $0xe8] sm:$0xff] }
  0x3d   :  { %160 = vmatpush1.msra.mxu0 %v1974_v18  ;;  %231 = vmatpush1.msra.mxu1 %v1983_v21  ;;  %v2019_v33 = vld [vmem:[#allocation8 + $0x110] sm:$0xff]  ;;  %v2022_v34 = vld [vmem:[#allocation8 + $0xe0] sm:$0xff]  ;;  %v2025_v35 = vld [vmem:[#allocation8 + $0xf8] sm:$0xff] }
  0x3e   :  { %161 = vmatprep.subr.mxu0 %v1980_v20  ;;  %232 = vmatprep.subr.mxu1 %v1989_v23  ;;  %v2028_v36 = vld [vmem:[#allocation8 + $0xc8] sm:$0xff]  ;;  %v2031_v37 = vld [vmem:[#allocation8 + $0xf0] sm:$0xff]  ;;  %v2034_v38 = vld [vmem:[#allocation8 + $0xc0] sm:$0xff] }
  0x3f   :  { %162 = vmatpush1.msra.mxu0 %v1986_v22  ;;  %233 = vmatpush1.msra.mxu1 %v1995_v25  ;;  %v2037_v39 = vld [vmem:[#allocation8 + $0xd8] sm:$0xff]  ;;  %v2040_v40 = vld [vmem:[#allocation8 + $0xa8] sm:$0xff]  ;;  %v2043_v41 = vld [vmem:[#allocation8 + $0xd0] sm:$0xff] }
  0x40   :  { %163 = vmatprep.subr.mxu0 %v1992_v24  ;;  %234 = vmatprep.subr.mxu1 %v2001_v27  ;;  %v2046_v42 = vld [vmem:[#allocation8 + $0xa0] sm:$0xff]  ;;  %v2049_v43 = vld [vmem:[#allocation8 + $0xb8] sm:$0xff]  ;;  %v2052_v44 = vld [vmem:[#allocation8 + $0x88] sm:$0xff] }
  0x41   :  { %164 = vmatpush1.msra.mxu0 %v1998_v26  ;;  %235 = vmatpush1.msra.mxu1 %v2007_v29  ;;  %v2055_v45 = vld [vmem:[#allocation8 + $0xb0] sm:$0xff]  ;;  %v2058_v46 = vld [vmem:[#allocation8 + $0x80] sm:$0xff]  ;;  %v2061_v47 = vld [vmem:[#allocation8 + $0x98] sm:$0xff] }
  0x42   :  { %165 = vmatprep.subr.mxu0 %v2004_v28  ;;  %236 = vmatprep.subr.mxu1 %v2013_v31  ;;  %2819 = vst [vmem:[#allocation21_spill] sm:$0xff] %v2058_v46  ;;  %2820 = vst [vmem:[#allocation22_spill] sm:$0xff] %v2061_v47  ;;  %v2064_v48 = vld [vmem:[#allocation8 + $0x68] sm:$0xff]  ;;  %v2067_v49 = vld [vmem:[#allocation8 + $0x90] sm:$0xff] }
  0x43   :  { %166 = vmatpush1.msra.mxu0 %v2010_v30  ;;  %237 = vmatpush1.msra.mxu1 %v2019_v33  ;;  %2821 = vst [vmem:[#allocation23_spill] sm:$0xff] %v2064_v48  ;;  %2822 = vst [vmem:[#allocation24_spill] sm:$0xff] %v2067_v49  ;;  %v2070_v50 = vld [vmem:[#allocation8 + $0x60] sm:$0xff]  ;;  %v2073_v51 = vld [vmem:[#allocation8 + $0x78] sm:$0xff] }
  0x44   :  { %167 = vmatprep.subr.mxu0 %v2016_v32  ;;  %238 = vmatprep.subr.mxu1 %v2025_v35  ;;  %2823 = vst [vmem:[#allocation25_spill] sm:$0xff] %v2070_v50  ;;  %2824 = vst [vmem:[#allocation26_spill] sm:$0xff] %v2073_v51  ;;  %v2076_v52 = vld [vmem:[#allocation8 + $0x48] sm:$0xff]  ;;  %v2079_v53 = vld [vmem:[#allocation8 + $0x70] sm:$0xff] }
  0x45   :  { %168 = vmatpush1.msra.mxu0 %v2022_v34  ;;  %239 = vmatpush1.msra.mxu1 %v2031_v37  ;;  %2825 = vst [vmem:[#allocation27_spill] sm:$0xff] %v2076_v52  ;;  %2826 = vst [vmem:[#allocation28_spill] sm:$0xff] %v2079_v53  ;;  %v2082_v54 = vld [vmem:[#allocation8 + $0x40] sm:$0xff]  ;;  %v2085_v55 = vld [vmem:[#allocation8 + $0x58] sm:$0xff] }
  0x46   :  { %169 = vmatprep.subr.mxu0 %v2028_v36  ;;  %240 = vmatprep.subr.mxu1 %v2037_v39  ;;  %2827 = vst [vmem:[#allocation29_spill] sm:$0xff] %v2082_v54  ;;  %2828 = vst [vmem:[#allocation30_spill] sm:$0xff] %v2085_v55  ;;  %v2088_v56 = vld [vmem:[#allocation8 + $0x28] sm:$0xff]  ;;  %v2091_v57 = vld [vmem:[#allocation8 + $0x50] sm:$0xff] }
  0x47   :  { %170 = vmatpush1.msra.mxu0 %v2034_v38  ;;  %241 = vmatpush1.msra.mxu1 %v2043_v41  ;;  %2829 = vst [vmem:[#allocation31_spill] sm:$0xff] %v2088_v56  ;;  %2830 = vst [vmem:[#allocation32_spill] sm:$0xff] %v2091_v57  ;;  %v2094_v58 = vld [vmem:[#allocation8 + $0x20] sm:$0xff]  ;;  %v2097_v59 = vld [vmem:[#allocation8 + $0x38] sm:$0xff] }
  0x48   :  { %171 = vmatprep.subr.mxu0 %v2040_v40  ;;  %242 = vmatprep.subr.mxu1 %v2049_v43  ;;  %2831 = vst [vmem:[#allocation33_spill] sm:$0xff] %v2094_v58  ;;  %2832 = vst [vmem:[#allocation34_spill] sm:$0xff] %v2097_v59  ;;  %v2100_v60 = vld [vmem:[#allocation8 + $0x8] sm:$0xff]  ;;  %v2103_v61 = vld [vmem:[#allocation8 + $0x30] sm:$0xff] }
  0x49   :  { %172 = vmatpush1.msra.mxu0 %v2046_v42  ;;  %243 = vmatpush1.msra.mxu1 %v2055_v45  ;;  %2833 = vst [vmem:[#allocation35_spill] sm:$0xff] %v2100_v60  ;;  %2834 = vst [vmem:[#allocation36_spill] sm:$0xff] %v2103_v61  ;;  %v2106_v62 = vld [vmem:[#allocation8] sm:$0xff]  ;;  %v2109_v63 = vld [vmem:[#allocation8 + $0x18] sm:$0xff] }
  0x4a   :  { %173 = vmatprep.subr.mxu0 %v2052_v44  ;;  %244 = vmatprep.subr.mxu1 %v2061_v47  ;;  %2835 = vst [vmem:[#allocation37_spill] sm:$0xff] %v2106_v62  ;;  %2836 = vst [vmem:[#allocation38_spill] sm:$0xff] %v2109_v63  ;;  %v77_v0 = vld [vmem:[#allocation5] sm:$0xff] }
  0x4b   :  { %174 = vmatpush1.msra.mxu0 %v2058_v46  ;;  %245 = vmatpush1.msra.mxu1 %v2067_v49 }
  0x4c   :  { %175 = vmatprep.subr.mxu0 %v2064_v48  ;;  %246 = vmatprep.subr.mxu1 %v2073_v51 }
  0x4d   :  { %176 = vmatpush1.msra.mxu0 %v2070_v50  ;;  %247 = vmatpush1.msra.mxu1 %v2079_v53 }
  0x4e   :  { %177 = vmatprep.subr.mxu0 %v2076_v52  ;;  %248 = vmatprep.subr.mxu1 %v2085_v55 }
  0x4f   :  { %178 = vmatpush1.msra.mxu0 %v2082_v54  ;;  %249 = vmatpush1.msra.mxu1 %v2091_v57  ;;  %v2113_v54 = vld [vmem:[#allocation8 + $0x10] sm:$0xff] }
  0x50   :  { %179 = vmatprep.subr.mxu0 %v2088_v56  ;;  %250 = vmatprep.subr.mxu1 %v2097_v59  ;;  %2837 = vst [vmem:[#allocation39_spill] sm:$0xff] %v2113_v54 }
  0x51   :  { %180 = vmatpush1.msra.mxu0 %v2094_v58  ;;  %251 = vmatpush1.msra.mxu1 %v2103_v61 }
  0x52   :  { %181 = vmatprep.subr.mxu0 %v2100_v60  ;;  %252 = vmatprep.subr.mxu1 %v2109_v63 }
  0x53   :  { %182 = vmatpush1.msra.mxu0 %v2106_v62  ;;  %253 = vmatpush1.msra.mxu1 %v2113_v54 }
  0x54   :  { %216 = vmatmul.mubr.f32.vlgmr.msra.gmra.mxu0 %v77_v0  ;;  %287 = vmatmul.mubr.f32.vlgmr.msra.gmra.mxu1 %v77_v0  ;;  %v2838_v0 = vld [vmem:[#allocation29_spill] sm:$0xff] }
  0x55   :  { %321 = vmatprep.subr.mxu0 %v1928_v1  ;;  %392 = vmatprep.subr.mxu1 %v1937_v5 }
  0x56   :  { %322 = vmatpush1.msra.mxu0 %v1930_v2  ;;  %393 = vmatpush1.msra.mxu1 %v1943_v7 }
  0x57   :  { %323 = vmatprep.subr.mxu0 %v1932_v3  ;;  %394 = vmatprep.subr.mxu1 %v1949_v9 }
  0x58   :  { %324 = vmatpush1.msra.mxu0 %v1935_v4  ;;  %395 = vmatpush1.msra.mxu1 %v1951_v10 }
  0x59   :  { %325 = vmatprep.subr.mxu0 %v1940_v6  ;;  %396 = vmatprep.subr.mxu1 %v1957_v12 }
  0x5a   :  { %326 = vmatpush1.msra.mxu0 %v1946_v8  ;;  %397 = vmatpush1.msra.mxu1 %v1963_v14 }
  0x5b   :  { %327 = vmatprep.subr.mxu0 %v1954_v11  ;;  %398 = vmatprep.subr.mxu1 %v1965_v15 }
  0x5c   :  { %328 = vmatpush1.msra.mxu0 %v1960_v13  ;;  %399 = vmatpush1.msra.mxu1 %v1971_v17 }
  0x5d   :  { %329 = vmatprep.subr.mxu0 %v1968_v16  ;;  %400 = vmatprep.subr.mxu1 %v1977_v19 }
  0x5e   :  { %330 = vmatpush1.msra.mxu0 %v1974_v18  ;;  %401 = vmatpush1.msra.mxu1 %v1983_v21 }
  0x5f   :  { %331 = vmatprep.subr.mxu0 %v1980_v20  ;;  %402 = vmatprep.subr.mxu1 %v1989_v23 }
  0x60   :  { %332 = vmatpush1.msra.mxu0 %v1986_v22  ;;  %403 = vmatpush1.msra.mxu1 %v1995_v25 }
  0x61   :  { %333 = vmatprep.subr.mxu0 %v1992_v24  ;;  %404 = vmatprep.subr.mxu1 %v2001_v27 }
  0x62   :  { %334 = vmatpush1.msra.mxu0 %v1998_v26  ;;  %405 = vmatpush1.msra.mxu1 %v2007_v29 }
  0x63   :  { %335 = vmatprep.subr.mxu0 %v2004_v28  ;;  %406 = vmatprep.subr.mxu1 %v2013_v31 }
  0x64   :  { %336 = vmatpush1.msra.mxu0 %v2010_v30  ;;  %407 = vmatpush1.msra.mxu1 %v2019_v33 }
  0x65   :  { %337 = vmatprep.subr.mxu0 %v2016_v32  ;;  %408 = vmatprep.subr.mxu1 %v2025_v35 }
  0x66   :  { %338 = vmatpush1.msra.mxu0 %v2022_v34  ;;  %409 = vmatpush1.msra.mxu1 %v2031_v37 }
  0x67   :  { %339 = vmatprep.subr.mxu0 %v2028_v36  ;;  %410 = vmatprep.subr.mxu1 %v2037_v39 }
  0x68   :  { %340 = vmatpush1.msra.mxu0 %v2034_v38  ;;  %411 = vmatpush1.msra.mxu1 %v2043_v41 }
  0x69   :  { %341 = vmatprep.subr.mxu0 %v2040_v40  ;;  %412 = vmatprep.subr.mxu1 %v2049_v43 }
  0x6a   :  { %342 = vmatpush1.msra.mxu0 %v2046_v42  ;;  %413 = vmatpush1.msra.mxu1 %v2055_v45 }
  0x6b   :  { %343 = vmatprep.subr.mxu0 %v2052_v44  ;;  %414 = vmatprep.subr.mxu1 %v2061_v47 }
  0x6c   :  { %344 = vmatpush1.msra.mxu0 %v2058_v46  ;;  %415 = vmatpush1.msra.mxu1 %v2067_v49 }
  0x6d   :  { %345 = vmatprep.subr.mxu0 %v2064_v48  ;;  %416 = vmatprep.subr.mxu1 %v2073_v51 }
  0x6e   :  { %346 = vmatpush1.msra.mxu0 %v2070_v50  ;;  %417 = vmatpush1.msra.mxu1 %v2079_v53 }
  0x6f   :  { %347 = vmatprep.subr.mxu0 %v2076_v52  ;;  %418 = vmatprep.subr.mxu1 %v2085_v55  ;;  %v2839_v52 = vmov 0.0  }
  0x70   :  { %348 = vmatpush1.msra.mxu0 %v2838_v0  ;;  %419 = vmatpush1.msra.mxu1 %v2091_v57  ;;  %v150_v0 = vld [vmem:[#allocation2 + $0x18] sm:$0xff] }
  0x71   :  { %349 = vmatprep.subr.mxu0 %v2088_v56  ;;  %420 = vmatprep.subr.mxu1 %v2097_v59  ;;  %v147_v59 = vld [vmem:[#allocation2] sm:$0xff]  ;;  %v148_v56 = vld [vmem:[#allocation2 + $0x8] sm:$0xff] }
  0x72   :  { %350 = vmatpush1.msra.mxu0 %v2094_v58  ;;  %421 = vmatpush1.msra.mxu1 %v2103_v61 }
  0x73   :  { %351 = vmatprep.subr.mxu0 %v2100_v60  ;;  %422 = vmatprep.subr.mxu1 %v2109_v63 }
  0x74   :  { %352 = vmatpush1.msra.mxu0 %v2106_v62  ;;  %385 = vmatprep.mubr.f32.mxu0 %v2839_v52 }
  0x75   :  { %423 = vmatpush1.msra.mxu1 %v2113_v54  ;;  %456 = vmatprep.mubr.f32.mxu1 %v2839_v52  ;;  %v149_v54 = vld [vmem:[#allocation2 + $0x10] sm:$0xff] }
  0x76   :  { %492 = vmatprep.subr.mxu0 %v1928_v1  ;;  %563 = vmatprep.subr.mxu1 %v1937_v5 }
 0x114   :  { %v217_v58 = vpop.f32.mrf.mxu0  ;;  %v288_v57 = vpop.f32.mrf.mxu1 }
 0x115   :  { %v293_v61 = vadd.f32 %v217_v58, %v147_v59  ;;  %v295_v52 = vadd.f32 %v288_v57, %v149_v54  ;;  %v79_v59 = vld [vmem:[#allocation7] sm:$0xff]  ;;  %v2847_v57 = vld [vmem:[#allocation27_spill] sm:$0xff] }
 0x116   :  { %v219_v60 = vpop.f32.mrf.mxu0  ;;  %v290_v62 = vpop.f32.mrf.mxu1 }
 0x117   :  { %v297_v63 = vmul.f32 0.5, %v293_v61  ;;  %v294_v55 = vadd.f32 %v219_v60, %v148_v56  ;;  %v296_v50 = vadd.f32 %v290_v62, %v150_v0  ;;  %v299_v1 = vmul.f32 0.5, %v295_v52  ;;  %v2848_v62 = vld [vmem:[#allocation30_spill] sm:$0xff]  ;;  %v2850_v0 = vld [vmem:[#allocation32_spill] sm:$0xff] }
 0x119   :  { %1573 = vtanh.f32 %v297_v63  ;;  %v298_v53 = vmul.f32 0.5, %v294_v55  ;;  %v2849_v63 = vld [vmem:[#allocation29_spill] sm:$0xff] }
 0x11b   :  { %1575 = vtanh.f32 %v298_v53 }
 0x11c   :  { %1577 = vtanh.f32 %v296_v50 }
 0x11d   :  { %1579 = vtanh.f32 %v299_v1  ;;  %v2840_v1 = vld [vmem:[#allocation22_spill] sm:$0xff] }
 0x126   :  { %v1574_v51 = vpop.eup %1573 }
 0x127   :  { %v303_v5 = vadd.f32 1.0, %v1574_v51  ;;  %v2846_v51 = vld [vmem:[#allocation28_spill] sm:$0xff] }
 0x128   :  { %v1576_v48 = vpop.eup %1575 }
 0x129   :  { %v306_v49 = vmul.f32 0.5, %v303_v5  ;;  %v304_v46 = vadd.f32 1.0, %v1576_v48  ;;  %v1578_v58 = vpop.eup %1577  ;;  %v2841_v5 = vld [vmem:[#allocation21_spill] sm:$0xff]  ;;  %v2844_v48 = vld [vmem:[#allocation26_spill] sm:$0xff] }
 0x12a   :  { %v1580_v53 = vpop.eup %1579 }
 0x12b   :  { %v307_v47 = vmul.f32 0.5, %v304_v46  ;;  %v311_v56 = vmul.f32 %v1578_v58, %v306_v49  ;;  %v305_v50 = vadd.f32 1.0, %v1580_v53  ;;  %v2842_v46 = vld [vmem:[#allocation24_spill] sm:$0xff]  ;;  %v2845_v49 = vld [vmem:[#allocation25_spill] sm:$0xff]  ;;  %v2851_v58 = vld [vmem:[#allocation31_spill] sm:$0xff] }
 0x12c   :  { %v2855_v53 = vld [vmem:[#allocation35_spill] sm:$0xff] }
 0x12d   :  { %v310_v61 = vmul.f32 %v307_v47, %v79_v59  ;;  %v308_v55 = vmul.f32 0.5, %v305_v50  ;;  %v2843_v47 = vld [vmem:[#allocation23_spill] sm:$0xff]  ;;  %v2852_v59 = vld [vmem:[#allocation34_spill] sm:$0xff] }
 0x12e   :  { %v2856_v50 = vld [vmem:[#allocation38_spill] sm:$0xff] }
 0x12f   :  { %v2188_v60 = vadd.f32 %v311_v56, %v310_v61  ;;  %v2853_v61 = vld [vmem:[#allocation33_spill] sm:$0xff]  ;;  %v2854_v56 = vld [vmem:[#allocation36_spill] sm:$0xff] }
 0x131   :  { %1581 = vtanh.f32 %v2188_v60 }
 0x13e   :  { %v1582_v54 = vpop.eup %1581 }
 0x13f   :  { %v314_v52 = vmul.f32 %v1582_v54, %v308_v55  ;;  %v2857_v55 = vld [vmem:[#allocation37_spill] sm:$0xff]  ;;  %v2858_v54 = vmov 0.0  }
 0x141   :  { %315 = vst [vmem:[#allocation10] sm:$0xff] %v314_v52  ;;  %386 = vmatmul.mubr.f32.vlgmr.msra.gmra.mxu0 %v314_v52  ;;  %457 = vmatmul.mubr.f32.vlgmr.msra.gmra.mxu1 %v314_v52  ;;  %v2859_v52 = vld [vmem:[#allocation39_spill] sm:$0xff] }
 0x142   :  { %493 = vmatpush1.msra.mxu0 %v1930_v2  ;;  %564 = vmatpush1.msra.mxu1 %v1943_v7 }
 0x143   :  { %494 = vmatprep.subr.mxu0 %v1932_v3  ;;  %565 = vmatprep.subr.mxu1 %v1949_v9 }
 0x144   :  { %495 = vmatpush1.msra.mxu0 %v1935_v4  ;;  %566 = vmatpush1.msra.mxu1 %v1951_v10 }
 0x145   :  { %496 = vmatprep.subr.mxu0 %v1940_v6  ;;  %567 = vmatprep.subr.mxu1 %v1957_v12 }
 0x146   :  { %497 = vmatpush1.msra.mxu0 %v1946_v8  ;;  %568 = vmatpush1.msra.mxu1 %v1963_v14 }
 0x147   :  { %498 = vmatprep.subr.mxu0 %v1954_v11  ;;  %569 = vmatprep.subr.mxu1 %v1965_v15 }
 0x148   :  { %499 = vmatpush1.msra.mxu0 %v1960_v13  ;;  %570 = vmatpush1.msra.mxu1 %v1971_v17 }
 0x149   :  { %500 = vmatprep.subr.mxu0 %v1968_v16  ;;  %571 = vmatprep.subr.mxu1 %v1977_v19 }
 0x14a   :  { %501 = vmatpush1.msra.mxu0 %v1974_v18  ;;  %572 = vmatpush1.msra.mxu1 %v1983_v21 }
 0x14b   :  { %502 = vmatprep.subr.mxu0 %v1980_v20  ;;  %573 = vmatprep.subr.mxu1 %v1989_v23 }
 0x14c   :  { %503 = vmatpush1.msra.mxu0 %v1986_v22  ;;  %574 = vmatpush1.msra.mxu1 %v1995_v25 }
 0x14d   :  { %504 = vmatprep.subr.mxu0 %v1992_v24  ;;  %575 = vmatprep.subr.mxu1 %v2001_v27 }
 0x14e   :  { %505 = vmatpush1.msra.mxu0 %v1998_v26  ;;  %576 = vmatpush1.msra.mxu1 %v2007_v29 }
 0x14f   :  { %506 = vmatprep.subr.mxu0 %v2004_v28  ;;  %577 = vmatprep.subr.mxu1 %v2013_v31 }
 0x150   :  { %507 = vmatpush1.msra.mxu0 %v2010_v30  ;;  %578 = vmatpush1.msra.mxu1 %v2019_v33 }
 0x151   :  { %508 = vmatprep.subr.mxu0 %v2016_v32  ;;  %579 = vmatprep.subr.mxu1 %v2025_v35 }
 0x152   :  { %509 = vmatpush1.msra.mxu0 %v2022_v34  ;;  %580 = vmatpush1.msra.mxu1 %v2031_v37 }
 0x153   :  { %510 = vmatprep.subr.mxu0 %v2028_v36  ;;  %581 = vmatprep.subr.mxu1 %v2037_v39 }
 0x154   :  { %511 = vmatpush1.msra.mxu0 %v2034_v38  ;;  %582 = vmatpush1.msra.mxu1 %v2043_v41 }
 0x155   :  { %512 = vmatprep.subr.mxu0 %v2040_v40  ;;  %583 = vmatprep.subr.mxu1 %v2049_v43 }
 0x156   :  { %513 = vmatpush1.msra.mxu0 %v2046_v42  ;;  %584 = vmatpush1.msra.mxu1 %v2055_v45 }
 0x157   :  { %514 = vmatprep.subr.mxu0 %v2052_v44  ;;  %585 = vmatprep.subr.mxu1 %v2840_v1 }
 0x158   :  { %515 = vmatpush1.msra.mxu0 %v2841_v5  ;;  %586 = vmatpush1.msra.mxu1 %v2842_v46 }
 0x159   :  { %516 = vmatprep.subr.mxu0 %v2843_v47  ;;  %587 = vmatprep.subr.mxu1 %v2844_v48  ;;  %v319_v48 = vld [vmem:[#allocation2 + $0x30] sm:$0xff] }
 0x15a   :  { %517 = vmatpush1.msra.mxu0 %v2845_v49  ;;  %588 = vmatpush1.msra.mxu1 %v2846_v51  ;;  %v320_v51 = vld [vmem:[#allocation2 + $0x38] sm:$0xff] }
 0x15b   :  { %518 = vmatprep.subr.mxu0 %v2847_v57  ;;  %589 = vmatprep.subr.mxu1 %v2848_v62 }
 0x15c   :  { %519 = vmatpush1.msra.mxu0 %v2849_v63  ;;  %590 = vmatpush1.msra.mxu1 %v2850_v0  ;;  %v2860_v0 = vld [vmem:[#allocation19_spill] sm:$0xff] }
 0x15d   :  { %520 = vmatprep.subr.mxu0 %v2851_v58  ;;  %591 = vmatprep.subr.mxu1 %v2852_v59  ;;  %v2861_v58 = vld [vmem:[#allocation20_spill] sm:$0xff]  ;;  %v317_v59 = vld [vmem:[#allocation2 + $0x20] sm:$0xff] }
 0x15e   :  { %521 = vmatpush1.msra.mxu0 %v2853_v61  ;;  %592 = vmatpush1.msra.mxu1 %v2854_v56  ;;  %v318_v56 = vld [vmem:[#allocation2 + $0x28] sm:$0xff] }
 0x15f   :  { %522 = vmatprep.subr.mxu0 %v2855_v53  ;;  %593 = vmatprep.subr.mxu1 %v2856_v50 }
 0x160   :  { %523 = vmatpush1.msra.mxu0 %v2857_v55  ;;  %556 = vmatprep.mubr.f32.mxu0 %v2858_v54 }
 0x161   :  { %594 = vmatpush1.msra.mxu1 %v2859_v52  ;;  %627 = vmatprep.mubr.f32.mxu1 %v2858_v54 }
 0x162   :  { %663 = vmatprep.subr.mxu0 %v2860_v0  ;;  %734 = vmatprep.subr.mxu1 %v2861_v58 }
 0x201   :  { %v387_v61 = vpop.f32.mrf.mxu0  ;;  %v458_v63 = vpop.f32.mrf.mxu1 }
 0x202   :  { %v463_v62 = vadd.f32 %v387_v61, %v317_v59  ;;  %v465_v54 = vadd.f32 %v458_v63, %v319_v48 }
 0x203   :  { %v389_v53 = vpop.f32.mrf.mxu0  ;;  %v460_v55 = vpop.f32.mrf.mxu1 }
 0x204   :  { %v467_v57 = vmul.f32 0.5, %v463_v62  ;;  %v464_v50 = vadd.f32 %v389_v53, %v318_v56  ;;  %v466_v52 = vadd.f32 %v460_v55, %v320_v51  ;;  %v469_v0 = vmul.f32 0.5, %v465_v54  ;;  %v2870_v55 = vld [vmem:[#allocation30_spill] sm:$0xff]  ;;  %v2871_v54 = vld [vmem:[#allocation29_spill] sm:$0xff] }
 0x206   :  { %1583 = vtanh.f32 %v467_v57  ;;  %v468_v49 = vmul.f32 0.5, %v464_v50  ;;  %v2869_v50 = vld [vmem:[#allocation27_spill] sm:$0xff] }
 0x208   :  { %1585 = vtanh.f32 %v468_v49 }
 0x209   :  { %1587 = vtanh.f32 %v466_v52  ;;  %v2872_v52 = vld [vmem:[#allocation32_spill] sm:$0xff] }
 0x20a   :  { %1589 = vtanh.f32 %v469_v0  ;;  %v2867_v0 = vld [vmem:[#allocation25_spill] sm:$0xff] }
 0x213   :  { %v1584_v47 = vpop.eup %1583 }
 0x214   :  { %v473_v58 = vadd.f32 1.0, %v1584_v47  ;;  %v2866_v47 = vld [vmem:[#allocation26_spill] sm:$0xff] }
 0x215   :  { %v1586_v46 = vpop.eup %1585 }
 0x216   :  { %v476_v5 = vmul.f32 0.5, %v473_v58  ;;  %v474_v1 = vadd.f32 1.0, %v1586_v46  ;;  %v1588_v61 = vpop.eup %1587  ;;  %v2865_v46 = vld [vmem:[#allocation23_spill] sm:$0xff]  ;;  %v2868_v58 = vld [vmem:[#allocation28_spill] sm:$0xff] }
 0x217   :  { %v1590_v49 = vpop.eup %1589 }
 0x218   :  { %v477_v59 = vmul.f32 0.5, %v474_v1  ;;  %v481_v56 = vmul.f32 %v1588_v61, %v476_v5  ;;  %v475_v51 = vadd.f32 1.0, %v1590_v49  ;;  %v2863_v1 = vld [vmem:[#allocation21_spill] sm:$0xff]  ;;  %v2864_v5 = vld [vmem:[#allocation24_spill] sm:$0xff]  ;;  %v2874_v61 = vld [vmem:[#allocation34_spill] sm:$0xff] }
 0x219   :  { %v2877_v49 = vld [vmem:[#allocation35_spill] sm:$0xff] }
 0x21a   :  { %v480_v62 = vmul.f32 %v477_v59, %v2188_v60  ;;  %v478_v57 = vmul.f32 0.5, %v475_v51  ;;  %v2862_v60 = vld [vmem:[#allocation22_spill] sm:$0xff]  ;;  %v2873_v59 = vld [vmem:[#allocation31_spill] sm:$0xff] }
 0x21b   :  { %v2878_v51 = vld [vmem:[#allocation38_spill] sm:$0xff] }
 0x21c   :  { %v2258_v53 = vadd.f32 %v481_v56, %v480_v62  ;;  %v2875_v62 = vld [vmem:[#allocation33_spill] sm:$0xff]  ;;  %v2876_v56 = vld [vmem:[#allocation36_spill] sm:$0xff] }
 0x21e   :  { %1591 = vtanh.f32 %v2258_v53 }
 0x22b   :  { %v1592_v48 = vpop.eup %1591 }
 0x22c   :  { %v484_v63 = vmul.f32 %v1592_v48, %v478_v57  ;;  %v2879_v57 = vld [vmem:[#allocation37_spill] sm:$0xff]  ;;  %v2880_v48 = vmov 0.0  }
 0x22e   :  { %486 = vst [vmem:[#allocation10 + $0x8] sm:$0xff] %v484_v63  ;;  %557 = vmatmul.mubr.f32.vlgmr.msra.gmra.mxu0 %v484_v63  ;;  %628 = vmatmul.mubr.f32.vlgmr.msra.gmra.mxu1 %v484_v63  ;;  %v2881_v63 = vld [vmem:[#allocation39_spill] sm:$0xff] }
 0x22f   :  { %664 = vmatpush1.msra.mxu0 %v1930_v2  ;;  %735 = vmatpush1.msra.mxu1 %v1943_v7 }
 0x230   :  { %665 = vmatprep.subr.mxu0 %v1932_v3  ;;  %736 = vmatprep.subr.mxu1 %v1949_v9 }
 0x231   :  { %666 = vmatpush1.msra.mxu0 %v1935_v4  ;;  %737 = vmatpush1.msra.mxu1 %v1951_v10 }
 0x232   :  { %667 = vmatprep.subr.mxu0 %v1940_v6  ;;  %738 = vmatprep.subr.mxu1 %v1957_v12 }
 0x233   :  { %668 = vmatpush1.msra.mxu0 %v1946_v8  ;;  %739 = vmatpush1.msra.mxu1 %v1963_v14 }
 0x234   :  { %669 = vmatprep.subr.mxu0 %v1954_v11  ;;  %740 = vmatprep.subr.mxu1 %v1965_v15 }
 0x235   :  { %670 = vmatpush1.msra.mxu0 %v1960_v13  ;;  %741 = vmatpush1.msra.mxu1 %v1971_v17 }
 0x236   :  { %671 = vmatprep.subr.mxu0 %v1968_v16  ;;  %742 = vmatprep.subr.mxu1 %v1977_v19 }
 0x237   :  { %672 = vmatpush1.msra.mxu0 %v1974_v18  ;;  %743 = vmatpush1.msra.mxu1 %v1983_v21 }
 0x238   :  { %673 = vmatprep.subr.mxu0 %v1980_v20  ;;  %744 = vmatprep.subr.mxu1 %v1989_v23 }
 0x239   :  { %674 = vmatpush1.msra.mxu0 %v1986_v22  ;;  %745 = vmatpush1.msra.mxu1 %v1995_v25 }
 0x23a   :  { %675 = vmatprep.subr.mxu0 %v1992_v24  ;;  %746 = vmatprep.subr.mxu1 %v2001_v27 }
 0x23b   :  { %676 = vmatpush1.msra.mxu0 %v1998_v26  ;;  %747 = vmatpush1.msra.mxu1 %v2007_v29 }
 0x23c   :  { %677 = vmatprep.subr.mxu0 %v2004_v28  ;;  %748 = vmatprep.subr.mxu1 %v2013_v31 }
 0x23d   :  { %678 = vmatpush1.msra.mxu0 %v2010_v30  ;;  %749 = vmatpush1.msra.mxu1 %v2019_v33 }
 0x23e   :  { %679 = vmatprep.subr.mxu0 %v2016_v32  ;;  %750 = vmatprep.subr.mxu1 %v2025_v35 }
 0x23f   :  { %680 = vmatpush1.msra.mxu0 %v2022_v34  ;;  %751 = vmatpush1.msra.mxu1 %v2031_v37 }
 0x240   :  { %681 = vmatprep.subr.mxu0 %v2028_v36  ;;  %752 = vmatprep.subr.mxu1 %v2037_v39 }
 0x241   :  { %682 = vmatpush1.msra.mxu0 %v2034_v38  ;;  %753 = vmatpush1.msra.mxu1 %v2043_v41 }
 0x242   :  { %683 = vmatprep.subr.mxu0 %v2040_v40  ;;  %754 = vmatprep.subr.mxu1 %v2049_v43 }
 0x243   :  { %684 = vmatpush1.msra.mxu0 %v2046_v42  ;;  %755 = vmatpush1.msra.mxu1 %v2055_v45 }
 0x244   :  { %685 = vmatprep.subr.mxu0 %v2052_v44  ;;  %756 = vmatprep.subr.mxu1 %v2862_v60 }
 0x245   :  { %686 = vmatpush1.msra.mxu0 %v2863_v1  ;;  %757 = vmatpush1.msra.mxu1 %v2864_v5 }
 0x246   :  { %687 = vmatprep.subr.mxu0 %v2865_v46  ;;  %758 = vmatprep.subr.mxu1 %v2866_v47  ;;  %v490_v47 = vld [vmem:[#allocation2 + $0x50] sm:$0xff] }
 0x247   :  { %688 = vmatpush1.msra.mxu0 %v2867_v0  ;;  %759 = vmatpush1.msra.mxu1 %v2868_v58  ;;  %v491_v58 = vld [vmem:[#allocation2 + $0x58] sm:$0xff] }
 0x248   :  { %689 = vmatprep.subr.mxu0 %v2869_v50  ;;  %760 = vmatprep.subr.mxu1 %v2870_v55 }
 0x249   :  { %690 = vmatpush1.msra.mxu0 %v2871_v54  ;;  %761 = vmatpush1.msra.mxu1 %v2872_v52  ;;  %v2882_v52 = vld [vmem:[#allocation19_spill] sm:$0xff] }
 0x24a   :  { %691 = vmatprep.subr.mxu0 %v2873_v59  ;;  %762 = vmatprep.subr.mxu1 %v2874_v61  ;;  %v2883_v59 = vld [vmem:[#allocation20_spill] sm:$0xff]  ;;  %v488_v61 = vld [vmem:[#allocation2 + $0x40] sm:$0xff] }
 0x24b   :  { %692 = vmatpush1.msra.mxu0 %v2875_v62  ;;  %763 = vmatpush1.msra.mxu1 %v2876_v56  ;;  %v489_v56 = vld [vmem:[#allocation2 + $0x48] sm:$0xff] }
 0x24c   :  { %693 = vmatprep.subr.mxu0 %v2877_v49  ;;  %764 = vmatprep.subr.mxu1 %v2878_v51 }
 0x24d   :  { %694 = vmatpush1.msra.mxu0 %v2879_v57  ;;  %727 = vmatprep.mubr.f32.mxu0 %v2880_v48 }
 0x24e   :  { %765 = vmatpush1.msra.mxu1 %v2881_v63  ;;  %798 = vmatprep.mubr.f32.mxu1 %v2880_v48 }
 0x24f   :  { %834 = vmatprep.subr.mxu0 %v2882_v52  ;;  %905 = vmatprep.subr.mxu1 %v2883_v59 }
 0x2ee   :  { %v558_v62 = vpop.f32.mrf.mxu0  ;;  %v629_v54 = vpop.f32.mrf.mxu1 }
 0x2ef   :  { %v634_v55 = vadd.f32 %v558_v62, %v488_v61  ;;  %v636_v48 = vadd.f32 %v629_v54, %v490_v47 }
 0x2f0   :  { %v560_v49 = vpop.f32.mrf.mxu0  ;;  %v631_v57 = vpop.f32.mrf.mxu1 }
 0x2f1   :  { %v638_v50 = vmul.f32 0.5, %v634_v55  ;;  %v635_v51 = vadd.f32 %v560_v49, %v489_v56  ;;  %v637_v63 = vadd.f32 %v631_v57, %v491_v58  ;;  %v640_v52 = vmul.f32 0.5, %v636_v48 }
 0x2f3   :  { %1593 = vtanh.f32 %v638_v50  ;;  %v639_v0 = vmul.f32 0.5, %v635_v51 }
 0x2f5   :  { %1595 = vtanh.f32 %v639_v0 }
 0x2f6   :  { %1597 = vtanh.f32 %v637_v63 }
 0x2f7   :  { %1599 = vtanh.f32 %v640_v52 }
 0x300   :  { %v1594_v46 = vpop.eup %1593 }
 0x301   :  { %v644_v59 = vadd.f32 1.0, %v1594_v46 }
 0x302   :  { %v1596_v5 = vpop.eup %1595 }
 0x303   :  { %v647_v1 = vmul.f32 0.5, %v644_v59  ;;  %v645_v60 = vadd.f32 1.0, %v1596_v5  ;;  %v1598_v62 = vpop.eup %1597 }
 0x304   :  { %v1600_v0 = vpop.eup %1599 }
 0x305   :  { %v648_v61 = vmul.f32 0.5, %v645_v60  ;;  %v652_v56 = vmul.f32 %v1598_v62, %v647_v1  ;;  %v646_v58 = vadd.f32 1.0, %v1600_v0  ;;  %v2401_v62 = vld [vmem:[#allocation8 + $0x1e0] sm:$0xff] }
 0x306   :  { %v2413_v0 = vld [vmem:[#allocation8 + $0x1c0] sm:$0xff] }
 0x307   :  { %v651_v55 = vmul.f32 %v648_v61, %v2258_v53  ;;  %v649_v50 = vmul.f32 0.5, %v646_v58  ;;  %v2416_v58 = vld [vmem:[#allocation8 + $0x1d0] sm:$0xff] }
 0x309   :  { %v2328_v49 = vadd.f32 %v652_v56, %v651_v55  ;;  %v2404_v55 = vld [vmem:[#allocation8 + $0x1f0] sm:$0xff]  ;;  %v2407_v56 = vld [vmem:[#allocation8 + $0x1c8] sm:$0xff] }
 0x30b   :  { %1601 = vtanh.f32 %v2328_v49 }
 0x318   :  { %v1602_v47 = vpop.eup %1601 }
 0x319   :  { %v655_v54 = vmul.f32 %v1602_v47, %v649_v50  ;;  %v2419_v50 = vld [vmem:[#allocation8 + $0x1a8] sm:$0xff]  ;;  %v2422_v47 = vld [vmem:[#allocation8 + $0x1b8] sm:$0xff] }
 0x31b   :  { %657 = vst [vmem:[#allocation10 + $0x10] sm:$0xff] %v655_v54  ;;  %728 = vmatmul.mubr.f32.vlgmr.msra.gmra.mxu0 %v655_v54  ;;  %799 = vmatmul.mubr.f32.vlgmr.msra.gmra.mxu1 %v655_v54  ;;  %v2425_v54 = vld [vmem:[#allocation8 + $0x1a0] sm:$0xff] }
 0x31c   :  { %835 = vmatpush1.msra.mxu0 %v1930_v2  ;;  %906 = vmatpush1.msra.mxu1 %v1943_v7  ;;  %v2884_v2 = vld [vmem:[#allocation22_spill] sm:$0xff] }
 0x31d   :  { %836 = vmatprep.subr.mxu0 %v1932_v3  ;;  %907 = vmatprep.subr.mxu1 %v1949_v9  ;;  %v2885_v3 = vld [vmem:[#allocation21_spill] sm:$0xff]  ;;  %v2888_v7 = vld [vmem:[#allocation26_spill] sm:$0xff]  ;;  %v2890_v9 = vld [vmem:[#allocation28_spill] sm:$0xff] }
 0x31e   :  { %837 = vmatpush1.msra.mxu0 %v1935_v4  ;;  %908 = vmatpush1.msra.mxu1 %v1951_v10  ;;  %v2886_v4 = vld [vmem:[#allocation24_spill] sm:$0xff]  ;;  %v2891_v10 = vld [vmem:[#allocation27_spill] sm:$0xff] }
 0x31f   :  { %838 = vmatprep.subr.mxu0 %v1940_v6  ;;  %909 = vmatprep.subr.mxu1 %v1957_v12  ;;  %v2887_v6 = vld [vmem:[#allocation23_spill] sm:$0xff]  ;;  %v2893_v12 = vld [vmem:[#allocation29_spill] sm:$0xff] }
 0x320   :  { %839 = vmatpush1.msra.mxu0 %v1946_v8  ;;  %910 = vmatpush1.msra.mxu1 %v1963_v14  ;;  %v2889_v8 = vld [vmem:[#allocation25_spill] sm:$0xff]  ;;  %v2895_v14 = vld [vmem:[#allocation31_spill] sm:$0xff] }
 0x321   :  { %840 = vmatprep.subr.mxu0 %v1954_v11  ;;  %911 = vmatprep.subr.mxu1 %v1965_v15  ;;  %v2892_v11 = vld [vmem:[#allocation30_spill] sm:$0xff] }
 0x322   :  { %841 = vmatpush1.msra.mxu0 %v1960_v13  ;;  %912 = vmatpush1.msra.mxu1 %v1971_v17  ;;  %v2894_v13 = vld [vmem:[#allocation32_spill] sm:$0xff]  ;;  %v2896_v15 = vld [vmem:[#allocation34_spill] sm:$0xff] }
 0x323   :  { %842 = vmatprep.subr.mxu0 %v1968_v16  ;;  %913 = vmatprep.subr.mxu1 %v1977_v19  ;;  %v2897_v16 = vld [vmem:[#allocation33_spill] sm:$0xff]  ;;  %v2898_v17 = vld [vmem:[#allocation36_spill] sm:$0xff]  ;;  %v2900_v19 = vld [vmem:[#allocation38_spill] sm:$0xff] }
 0x324   :  { %843 = vmatpush1.msra.mxu0 %v1974_v18  ;;  %914 = vmatpush1.msra.mxu1 %v1983_v21  ;;  %v2899_v18 = vld [vmem:[#allocation35_spill] sm:$0xff]  ;;  %v2902_v21 = vmov 0.0  }
 0x325   :  { %844 = vmatprep.subr.mxu0 %v1980_v20  ;;  %915 = vmatprep.subr.mxu1 %v1989_v23  ;;  %v2901_v20 = vld [vmem:[#allocation37_spill] sm:$0xff]  ;;  %v2904_v23 = vld [vmem:[#allocation19_spill] sm:$0xff] }
 0x326   :  { %845 = vmatpush1.msra.mxu0 %v1986_v22  ;;  %916 = vmatpush1.msra.mxu1 %v1995_v25  ;;  %v2903_v22 = vld [vmem:[#allocation39_spill] sm:$0xff] }
 0x327   :  { %846 = vmatprep.subr.mxu0 %v1992_v24  ;;  %917 = vmatprep.subr.mxu1 %v2001_v27  ;;  %v2905_v24 = vld [vmem:[#allocation20_spill] sm:$0xff]  ;;  %v659_v25 = vld [vmem:[#allocation2 + $0x60] sm:$0xff] }
 0x328   :  { %847 = vmatpush1.msra.mxu0 %v1998_v26  ;;  %918 = vmatpush1.msra.mxu1 %v2007_v29 }
 0x329   :  { %848 = vmatprep.subr.mxu0 %v2004_v28  ;;  %919 = vmatprep.subr.mxu1 %v2013_v31  ;;  %v660_v28 = vld [vmem:[#allocation2 + $0x68] sm:$0xff] }
 0x32a   :  { %849 = vmatpush1.msra.mxu0 %v2010_v30  ;;  %920 = vmatpush1.msra.mxu1 %v2019_v33  ;;  %v662_v33 = vld [vmem:[#allocation2 + $0x78] sm:$0xff] }
 0x32b   :  { %850 = vmatprep.subr.mxu0 %v2016_v32  ;;  %921 = vmatprep.subr.mxu1 %v2025_v35 }
 0x32c   :  { %851 = vmatpush1.msra.mxu0 %v2022_v34  ;;  %922 = vmatpush1.msra.mxu1 %v2031_v37  ;;  %v661_v37 = vld [vmem:[#allocation2 + $0x70] sm:$0xff] }
 0x32d   :  { %852 = vmatprep.subr.mxu0 %v2028_v36  ;;  %923 = vmatprep.subr.mxu1 %v2037_v39 }
 0x32e   :  { %853 = vmatpush1.msra.mxu0 %v2034_v38  ;;  %924 = vmatpush1.msra.mxu1 %v2043_v41 }
 0x32f   :  { %854 = vmatprep.subr.mxu0 %v2040_v40  ;;  %925 = vmatprep.subr.mxu1 %v2049_v43 }
 0x330   :  { %855 = vmatpush1.msra.mxu0 %v2046_v42  ;;  %926 = vmatpush1.msra.mxu1 %v2055_v45 }
 0x331   :  { %856 = vmatprep.subr.mxu0 %v2052_v44  ;;  %927 = vmatprep.subr.mxu1 %v2884_v2 }
 0x332   :  { %857 = vmatpush1.msra.mxu0 %v2885_v3  ;;  %928 = vmatpush1.msra.mxu1 %v2886_v4 }
 0x333   :  { %858 = vmatprep.subr.mxu0 %v2887_v6  ;;  %929 = vmatprep.subr.mxu1 %v2888_v7 }
 0x334   :  { %859 = vmatpush1.msra.mxu0 %v2889_v8  ;;  %930 = vmatpush1.msra.mxu1 %v2890_v9 }
 0x335   :  { %860 = vmatprep.subr.mxu0 %v2891_v10  ;;  %931 = vmatprep.subr.mxu1 %v2892_v11 }
 0x336   :  { %861 = vmatpush1.msra.mxu0 %v2893_v12  ;;  %932 = vmatpush1.msra.mxu1 %v2894_v13 }
 0x337   :  { %862 = vmatprep.subr.mxu0 %v2895_v14  ;;  %933 = vmatprep.subr.mxu1 %v2896_v15 }
 0x338   :  { %863 = vmatpush1.msra.mxu0 %v2897_v16  ;;  %934 = vmatpush1.msra.mxu1 %v2898_v17 }
 0x339   :  { %864 = vmatprep.subr.mxu0 %v2899_v18  ;;  %935 = vmatprep.subr.mxu1 %v2900_v19 }
 0x33a   :  { %865 = vmatpush1.msra.mxu0 %v2901_v20  ;;  %898 = vmatprep.mubr.f32.mxu0 %v2902_v21 }
 0x33b   :  { %936 = vmatpush1.msra.mxu1 %v2903_v22  ;;  %969 = vmatprep.mubr.f32.mxu1 %v2902_v21 }
 0x33c   :  { %1005 = vmatprep.subr.mxu0 %v2904_v23  ;;  %1076 = vmatprep.subr.mxu1 %v2905_v24  ;;  %v2428_v23 = vld [vmem:[#allocation8 + $0x1b0] sm:$0xff]  ;;  %v2431_v24 = vld [vmem:[#allocation8 + $0x188] sm:$0xff] }
 0x3db   :  { %v729_v26 = vpop.f32.mrf.mxu0  ;;  %v800_v27 = vpop.f32.mrf.mxu1 }
 0x3dc   :  { %v805_v29 = vadd.f32 %v729_v26, %v659_v25  ;;  %v807_v38 = vadd.f32 %v800_v27, %v661_v37  ;;  %v2434_v25 = vld [vmem:[#allocation8 + $0x198] sm:$0xff]  ;;  %v2437_v26 = vld [vmem:[#allocation8 + $0x180] sm:$0xff]  ;;  %v2440_v27 = vld [vmem:[#allocation8 + $0x190] sm:$0xff] }
 0x3dd   :  { %v731_v30 = vpop.f32.mrf.mxu0  ;;  %v802_v34 = vpop.f32.mrf.mxu1  ;;  %v2470_v37 = vld [vmem:[#allocation8 + $0x138] sm:$0xff] }
 0x3de   :  { %v809_v31 = vmul.f32 0.5, %v805_v29  ;;  %v806_v32 = vadd.f32 %v731_v30, %v660_v28  ;;  %v808_v36 = vadd.f32 %v802_v34, %v662_v33  ;;  %v811_v39 = vmul.f32 0.5, %v807_v38  ;;  %v2443_v28 = vld [vmem:[#allocation8 + $0x168] sm:$0xff]  ;;  %v2446_v29 = vld [vmem:[#allocation8 + $0x178] sm:$0xff]  ;;  %v2449_v30 = vld [vmem:[#allocation8 + $0x160] sm:$0xff] }
 0x3df   :  { %v2458_v33 = vld [vmem:[#allocation8 + $0x158] sm:$0xff]  ;;  %v2461_v34 = vld [vmem:[#allocation8 + $0x140] sm:$0xff] }
 0x3e0   :  { %1603 = vtanh.f32 %v809_v31  ;;  %v810_v35 = vmul.f32 0.5, %v806_v32  ;;  %v2452_v31 = vld [vmem:[#allocation8 + $0x170] sm:$0xff]  ;;  %v2455_v32 = vld [vmem:[#allocation8 + $0x148] sm:$0xff]  ;;  %v2473_v38 = vld [vmem:[#allocation8 + $0x120] sm:$0xff] }
 0x3e2   :  { %1605 = vtanh.f32 %v810_v35  ;;  %v2464_v35 = vld [vmem:[#allocation8 + $0x150] sm:$0xff] }
 0x3e3   :  { %1607 = vtanh.f32 %v808_v36  ;;  %v2467_v36 = vld [vmem:[#allocation8 + $0x128] sm:$0xff] }
 0x3e4   :  { %1609 = vtanh.f32 %v811_v39  ;;  %v2476_v39 = vld [vmem:[#allocation8 + $0x130] sm:$0xff] }
 0x3ed   :  { %v1604_v40 = vpop.eup %1603 }
 0x3ee   :  { %v815_v41 = vadd.f32 1.0, %v1604_v40  ;;  %v2479_v40 = vld [vmem:[#allocation8 + $0x108] sm:$0xff] }
 0x3ef   :  { %v1606_v42 = vpop.eup %1605 }
 0x3f0   :  { %v818_v53 = vmul.f32 0.5, %v815_v41  ;;  %v816_v60 = vadd.f32 1.0, %v1606_v42  ;;  %v1608_v5 = vpop.eup %1607  ;;  %v2482_v41 = vld [vmem:[#allocation8 + $0x118] sm:$0xff]  ;;  %v2485_v42 = vld [vmem:[#allocation8 + $0x100] sm:$0xff] }
 0x3f1   :  { %v1610_v51 = vpop.eup %1609 }
 0x3f2   :  { %v819_v1 = vmul.f32 0.5, %v816_v60  ;;  %v823_v52 = vmul.f32 %v1608_v5, %v818_v53  ;;  %v817_v57 = vadd.f32 1.0, %v1610_v51  ;;  %v2488_v53 = vld [vmem:[#allocation8 + $0x110] sm:$0xff]  ;;  %v2491_v60 = vld [vmem:[#allocation8 + $0xe8] sm:$0xff]  ;;  %v2497_v5 = vld [vmem:[#allocation8 + $0xe0] sm:$0xff] }
 0x3f3   :  { %v2506_v51 = vld [vmem:[#allocation8 + $0xd8] sm:$0xff] }
 0x3f4   :  { %v822_v46 = vmul.f32 %v819_v1, %v2328_v49  ;;  %v820_v48 = vmul.f32 0.5, %v817_v57  ;;  %v2410_v49 = vld [vmem:[#allocation8 + $0x1d8] sm:$0xff]  ;;  %v2509_v57 = vld [vmem:[#allocation8 + $0xc0] sm:$0xff] }
 0x3f5   :  { %v2494_v1 = vld [vmem:[#allocation8 + $0xf8] sm:$0xff] }
 0x3f6   :  { %v2398_v59 = vadd.f32 %v823_v52, %v822_v46  ;;  %v2500_v46 = vld [vmem:[#allocation8 + $0xf0] sm:$0xff]  ;;  %v2503_v52 = vld [vmem:[#allocation8 + $0xc8] sm:$0xff] }
 0x3f8   :  { %1611 = vtanh.f32 %v2398_v59 }
 0x405   :  { %v1612_v63 = vpop.eup %1611 }
 0x406   :  { %v826_v61 = vmul.f32 %v1612_v63, %v820_v48  ;;  %v2512_v48 = vld [vmem:[#allocation8 + $0xd0] sm:$0xff]  ;;  %v2515_v63 = vld [vmem:[#allocation8 + $0xa8] sm:$0xff] }
 0x408   :  { %828 = vst [vmem:[#allocation10 + $0x18] sm:$0xff] %v826_v61  ;;  %899 = vmatmul.mubr.f32.vlgmr.msra.gmra.mxu0 %v826_v61  ;;  %970 = vmatmul.mubr.f32.vlgmr.msra.gmra.mxu1 %v826_v61  ;;  %v2519_v61 = vld [vmem:[#allocation8 + $0xa0] sm:$0xff] }
 0x409   :  { %1006 = vmatpush1.msra.mxu0 %v2401_v62  ;;  %1077 = vmatpush1.msra.mxu1 %v2404_v55 }
 0x40a   :  { %1007 = vmatprep.subr.mxu0 %v2407_v56  ;;  %1078 = vmatprep.subr.mxu1 %v2410_v49 }
 0x40b   :  { %1008 = vmatpush1.msra.mxu0 %v2413_v0  ;;  %1079 = vmatpush1.msra.mxu1 %v2416_v58 }
 0x40c   :  { %1009 = vmatprep.subr.mxu0 %v2419_v50  ;;  %1080 = vmatprep.subr.mxu1 %v2422_v47 }
 0x40d   :  { %1010 = vmatpush1.msra.mxu0 %v2425_v54  ;;  %1081 = vmatpush1.msra.mxu1 %v2428_v23 }
 0x40e   :  { %1011 = vmatprep.subr.mxu0 %v2431_v24  ;;  %1082 = vmatprep.subr.mxu1 %v2434_v25 }
 0x40f   :  { %1012 = vmatpush1.msra.mxu0 %v2437_v26  ;;  %1083 = vmatpush1.msra.mxu1 %v2440_v27 }
 0x410   :  { %1013 = vmatprep.subr.mxu0 %v2443_v28  ;;  %1084 = vmatprep.subr.mxu1 %v2446_v29 }
 0x411   :  { %1014 = vmatpush1.msra.mxu0 %v2449_v30  ;;  %1085 = vmatpush1.msra.mxu1 %v2452_v31 }
 0x412   :  { %1015 = vmatprep.subr.mxu0 %v2455_v32  ;;  %1086 = vmatprep.subr.mxu1 %v2458_v33 }
 0x413   :  { %1016 = vmatpush1.msra.mxu0 %v2461_v34  ;;  %1087 = vmatpush1.msra.mxu1 %v2464_v35 }
 0x414   :  { %1017 = vmatprep.subr.mxu0 %v2467_v36  ;;  %1088 = vmatprep.subr.mxu1 %v2470_v37 }
 0x415   :  { %1018 = vmatpush1.msra.mxu0 %v2473_v38  ;;  %1089 = vmatpush1.msra.mxu1 %v2476_v39 }
 0x416   :  { %1019 = vmatprep.subr.mxu0 %v2479_v40  ;;  %1090 = vmatprep.subr.mxu1 %v2482_v41 }
 0x417   :  { %1020 = vmatpush1.msra.mxu0 %v2485_v42  ;;  %1091 = vmatpush1.msra.mxu1 %v2488_v53 }
 0x418   :  { %1021 = vmatprep.subr.mxu0 %v2491_v60  ;;  %1092 = vmatprep.subr.mxu1 %v2494_v1 }
 0x419   :  { %1022 = vmatpush1.msra.mxu0 %v2497_v5  ;;  %1093 = vmatpush1.msra.mxu1 %v2500_v46 }
 0x41a   :  { %1023 = vmatprep.subr.mxu0 %v2503_v52  ;;  %1094 = vmatprep.subr.mxu1 %v2506_v51 }
 0x41b   :  { %1024 = vmatpush1.msra.mxu0 %v2509_v57  ;;  %1095 = vmatpush1.msra.mxu1 %v2512_v48 }
 0x41c   :  { %1025 = vmatprep.subr.mxu0 %v2515_v63  ;;  %1096 = vmatprep.subr.mxu1 %v2049_v43  ;;  %v2545_v43 = vld [vmem:[#allocation8 + $0x1e8] sm:$0xff] }
 0x41d   :  { %1026 = vmatpush1.msra.mxu0 %v2519_v61  ;;  %1097 = vmatpush1.msra.mxu1 %v2055_v45  ;;  %v830_v45 = vld [vmem:[#allocation2 + $0x80] sm:$0xff] }
 0x41e   :  { %1027 = vmatprep.subr.mxu0 %v2052_v44  ;;  %1098 = vmatprep.subr.mxu1 %v2884_v2  ;;  %v2548_v44 = vld [vmem:[#allocation8 + $0x1f8] sm:$0xff] }
 0x41f   :  { %1028 = vmatpush1.msra.mxu0 %v2885_v3  ;;  %1099 = vmatpush1.msra.mxu1 %v2886_v4  ;;  %v831_v4 = vld [vmem:[#allocation2 + $0x88] sm:$0xff] }
 0x420   :  { %1029 = vmatprep.subr.mxu0 %v2887_v6  ;;  %1100 = vmatprep.subr.mxu1 %v2888_v7 }
 0x421   :  { %1030 = vmatpush1.msra.mxu0 %v2889_v8  ;;  %1101 = vmatpush1.msra.mxu1 %v2890_v9 }
 0x422   :  { %1031 = vmatprep.subr.mxu0 %v2891_v10  ;;  %1102 = vmatprep.subr.mxu1 %v2892_v11  ;;  %v833_v10 = vld [vmem:[#allocation2 + $0x98] sm:$0xff] }
 0x423   :  { %1032 = vmatpush1.msra.mxu0 %v2893_v12  ;;  %1103 = vmatpush1.msra.mxu1 %v2894_v13 }
 0x424   :  { %1033 = vmatprep.subr.mxu0 %v2895_v14  ;;  %1104 = vmatprep.subr.mxu1 %v2896_v15  ;;  %v832_v14 = vld [vmem:[#allocation2 + $0x90] sm:$0xff] }
 0x425   :  { %1034 = vmatpush1.msra.mxu0 %v2897_v16  ;;  %1105 = vmatpush1.msra.mxu1 %v2898_v17 }
 0x426   :  { %1035 = vmatprep.subr.mxu0 %v2899_v18  ;;  %1106 = vmatprep.subr.mxu1 %v2900_v19 }
 0x427   :  { %1036 = vmatpush1.msra.mxu0 %v2901_v20  ;;  %1069 = vmatprep.mubr.f32.mxu0 %v2902_v21 }
 0x428   :  { %1107 = vmatpush1.msra.mxu1 %v2903_v22  ;;  %1140 = vmatprep.mubr.f32.mxu1 %v2902_v21 }
 0x429   :  { %1176 = vmatprep.subr.mxu0 %v2545_v43  ;;  %1247 = vmatprep.subr.mxu1 %v2548_v44 }
 0x4c8   :  { %v900_v2 = vpop.f32.mrf.mxu0  ;;  %v971_v3 = vpop.f32.mrf.mxu1 }
 0x4c9   :  { %v976_v6 = vadd.f32 %v900_v2, %v830_v45  ;;  %v978_v15 = vadd.f32 %v971_v3, %v832_v14  ;;  %v2604_v14 = vld [vmem:[#allocation8 + $0x98] sm:$0xff] }
 0x4ca   :  { %v902_v7 = vpop.f32.mrf.mxu0  ;;  %v973_v11 = vpop.f32.mrf.mxu1  ;;  %2906 = vst [vmem:[#allocation22_spill] sm:$0xff] %v2604_v14 }
 0x4cb   :  { %v980_v8 = vmul.f32 0.5, %v976_v6  ;;  %v977_v9 = vadd.f32 %v902_v7, %v831_v4  ;;  %v979_v13 = vadd.f32 %v973_v11, %v833_v10  ;;  %v982_v16 = vmul.f32 0.5, %v978_v15  ;;  %v2607_v15 = vld [vmem:[#allocation8 + $0x80] sm:$0xff] }
 0x4cc   :  { %2907 = vst [vmem:[#allocation21_spill] sm:$0xff] %v2607_v15 }
 0x4cd   :  { %1613 = vtanh.f32 %v980_v8  ;;  %v981_v12 = vmul.f32 0.5, %v977_v9 }
 0x4cf   :  { %1615 = vtanh.f32 %v981_v12  ;;  %v2598_v12 = vld [vmem:[#allocation8 + $0xb0] sm:$0xff] }
 0x4d0   :  { %1617 = vtanh.f32 %v979_v13  ;;  %v2601_v13 = vld [vmem:[#allocation8 + $0x88] sm:$0xff] }
 0x4d1   :  { %1619 = vtanh.f32 %v982_v16  ;;  %v2610_v16 = vld [vmem:[#allocation8 + $0x90] sm:$0xff] }
 0x4d2   :  { %2908 = vst [vmem:[#allocation24_spill] sm:$0xff] %v2610_v16 }
 0x4da   :  { %v1614_v17 = vpop.eup %1613 }
 0x4db   :  { %v986_v18 = vadd.f32 1.0, %v1614_v17  ;;  %v2613_v17 = vld [vmem:[#allocation8 + $0x68] sm:$0xff] }
 0x4dc   :  { %v1616_v19 = vpop.eup %1615  ;;  %2909 = vst [vmem:[#allocation23_spill] sm:$0xff] %v2613_v17 }
 0x4dd   :  { %v989_v20 = vmul.f32 0.5, %v986_v18  ;;  %v987_v22 = vadd.f32 1.0, %v1616_v19  ;;  %v1618_v2 = vpop.eup %1617  ;;  %v2616_v18 = vld [vmem:[#allocation8 + $0x78] sm:$0xff]  ;;  %v2619_v19 = vld [vmem:[#allocation8 + $0x60] sm:$0xff] }
 0x4de   :  { %v1620_v8 = vpop.eup %1619  ;;  %2910 = vst [vmem:[#allocation26_spill] sm:$0xff] %v2616_v18  ;;  %2911 = vst [vmem:[#allocation25_spill] sm:$0xff] %v2619_v19 }
 0x4df   :  { %v990_v45 = vmul.f32 0.5, %v987_v22  ;;  %v994_v6 = vmul.f32 %v1618_v2, %v989_v20  ;;  %v988_v9 = vadd.f32 1.0, %v1620_v8  ;;  %v2622_v20 = vld [vmem:[#allocation8 + $0x70] sm:$0xff]  ;;  %v2625_v22 = vld [vmem:[#allocation8 + $0x48] sm:$0xff]  ;;  %v2631_v2 = vld [vmem:[#allocation8 + $0x40] sm:$0xff] }
 0x4e0   :  { %2912 = vst [vmem:[#allocation28_spill] sm:$0xff] %v2622_v20  ;;  %2913 = vst [vmem:[#allocation27_spill] sm:$0xff] %v2625_v22  ;;  %v2640_v8 = vld [vmem:[#allocation8 + $0x38] sm:$0xff] }
 0x4e1   :  { %v993_v4 = vmul.f32 %v990_v45, %v2398_v59  ;;  %v991_v10 = vmul.f32 0.5, %v988_v9  ;;  %v2594_v59 = vld [vmem:[#allocation8 + $0xb8] sm:$0xff]  ;;  %2915 = vst [vmem:[#allocation29_spill] sm:$0xff] %v2631_v2  ;;  %2918 = vst [vmem:[#allocation34_spill] sm:$0xff] %v2640_v8  ;;  %v2643_v9 = vld [vmem:[#allocation8 + $0x20] sm:$0xff] }
 0x4e2   :  { %v2628_v45 = vld [vmem:[#allocation8 + $0x58] sm:$0xff]  ;;  %2919 = vst [vmem:[#allocation33_spill] sm:$0xff] %v2643_v9 }
 0x4e3   :  { %v2552_v7 = vadd.f32 %v994_v6, %v993_v4  ;;  %2914 = vst [vmem:[#allocation30_spill] sm:$0xff] %v2628_v45  ;;  %v2634_v4 = vld [vmem:[#allocation8 + $0x50] sm:$0xff]  ;;  %v2637_v6 = vld [vmem:[#allocation8 + $0x28] sm:$0xff] }
 0x4e4   :  { %2916 = vst [vmem:[#allocation32_spill] sm:$0xff] %v2634_v4  ;;  %2917 = vst [vmem:[#allocation31_spill] sm:$0xff] %v2637_v6 }
 0x4e5   :  { %1621 = vtanh.f32 %v2552_v7 }
 0x4f2   :  { %v1622_v3 = vpop.eup %1621 }
 0x4f3   :  { %v997_v11 = vmul.f32 %v1622_v3, %v991_v10  ;;  %v2646_v10 = vld [vmem:[#allocation8 + $0x30] sm:$0xff]  ;;  %v2649_v3 = vld [vmem:[#allocation8 + $0x8] sm:$0xff] }
 0x4f4   :  { %2920 = vst [vmem:[#allocation36_spill] sm:$0xff] %v2646_v10  ;;  %2921 = vst [vmem:[#allocation35_spill] sm:$0xff] %v2649_v3 }
 0x4f5   :  { %999 = vst [vmem:[#allocation10 + $0x20] sm:$0xff] %v997_v11  ;;  %1070 = vmatmul.mubr.f32.vlgmr.msra.gmra.mxu0 %v997_v11  ;;  %1141 = vmatmul.mubr.f32.vlgmr.msra.gmra.mxu1 %v997_v11  ;;  %v2652_v11 = vld [vmem:[#allocation8 + $0x18] sm:$0xff] }
 0x4f6   :  { %1177 = vmatpush1.msra.mxu0 %v2401_v62  ;;  %1248 = vmatpush1.msra.mxu1 %v2404_v55  ;;  %2922 = vst [vmem:[#allocation38_spill] sm:$0xff] %v2652_v11 }
 0x4f7   :  { %1178 = vmatprep.subr.mxu0 %v2407_v56  ;;  %1249 = vmatprep.subr.mxu1 %v2410_v49 }
 0x4f8   :  { %1179 = vmatpush1.msra.mxu0 %v2413_v0  ;;  %1250 = vmatpush1.msra.mxu1 %v2416_v58 }
 0x4f9   :  { %1180 = vmatprep.subr.mxu0 %v2419_v50  ;;  %1251 = vmatprep.subr.mxu1 %v2422_v47 }
 0x4fa   :  { %1181 = vmatpush1.msra.mxu0 %v2425_v54  ;;  %1252 = vmatpush1.msra.mxu1 %v2428_v23 }
 0x4fb   :  { %1182 = vmatprep.subr.mxu0 %v2431_v24  ;;  %1253 = vmatprep.subr.mxu1 %v2434_v25 }
 0x4fc   :  { %1183 = vmatpush1.msra.mxu0 %v2437_v26  ;;  %1254 = vmatpush1.msra.mxu1 %v2440_v27 }
 0x4fd   :  { %1184 = vmatprep.subr.mxu0 %v2443_v28  ;;  %1255 = vmatprep.subr.mxu1 %v2446_v29 }
 0x4fe   :  { %1185 = vmatpush1.msra.mxu0 %v2449_v30  ;;  %1256 = vmatpush1.msra.mxu1 %v2452_v31 }
 0x4ff   :  { %1186 = vmatprep.subr.mxu0 %v2455_v32  ;;  %1257 = vmatprep.subr.mxu1 %v2458_v33 }
 0x500   :  { %1187 = vmatpush1.msra.mxu0 %v2461_v34  ;;  %1258 = vmatpush1.msra.mxu1 %v2464_v35 }
 0x501   :  { %1188 = vmatprep.subr.mxu0 %v2467_v36  ;;  %1259 = vmatprep.subr.mxu1 %v2470_v37 }
 0x502   :  { %1189 = vmatpush1.msra.mxu0 %v2473_v38  ;;  %1260 = vmatpush1.msra.mxu1 %v2476_v39 }
 0x503   :  { %1190 = vmatprep.subr.mxu0 %v2479_v40  ;;  %1261 = vmatprep.subr.mxu1 %v2482_v41 }
 0x504   :  { %1191 = vmatpush1.msra.mxu0 %v2485_v42  ;;  %1262 = vmatpush1.msra.mxu1 %v2488_v53 }
 0x505   :  { %1192 = vmatprep.subr.mxu0 %v2491_v60  ;;  %1263 = vmatprep.subr.mxu1 %v2494_v1 }
 0x506   :  { %1193 = vmatpush1.msra.mxu0 %v2497_v5  ;;  %1264 = vmatpush1.msra.mxu1 %v2500_v46 }
 0x507   :  { %1194 = vmatprep.subr.mxu0 %v2503_v52  ;;  %1265 = vmatprep.subr.mxu1 %v2506_v51 }
 0x508   :  { %1195 = vmatpush1.msra.mxu0 %v2509_v57  ;;  %1266 = vmatpush1.msra.mxu1 %v2512_v48 }
 0x509   :  { %1196 = vmatprep.subr.mxu0 %v2515_v63  ;;  %1267 = vmatprep.subr.mxu1 %v2594_v59 }
 0x50a   :  { %1197 = vmatpush1.msra.mxu0 %v2519_v61  ;;  %1268 = vmatpush1.msra.mxu1 %v2598_v12 }
 0x50b   :  { %1198 = vmatprep.subr.mxu0 %v2601_v13  ;;  %1269 = vmatprep.subr.mxu1 %v2604_v14 }
 0x50c   :  { %1199 = vmatpush1.msra.mxu0 %v2607_v15  ;;  %1270 = vmatpush1.msra.mxu1 %v2610_v16 }
 0x50d   :  { %1200 = vmatprep.subr.mxu0 %v2613_v17  ;;  %1271 = vmatprep.subr.mxu1 %v2616_v18  ;;  %v1003_v18 = vld [vmem:[#allocation2 + $0xb0] sm:$0xff] }
 0x50e   :  { %1201 = vmatpush1.msra.mxu0 %v2619_v19  ;;  %1272 = vmatpush1.msra.mxu1 %v2622_v20 }
 0x50f   :  { %1202 = vmatprep.subr.mxu0 %v2625_v22  ;;  %1273 = vmatprep.subr.mxu1 %v2628_v45  ;;  %v1004_v22 = vld [vmem:[#allocation2 + $0xb8] sm:$0xff] }
 0x510   :  { %1203 = vmatpush1.msra.mxu0 %v2631_v2  ;;  %1274 = vmatpush1.msra.mxu1 %v2634_v4 }
 0x511   :  { %1204 = vmatprep.subr.mxu0 %v2637_v6  ;;  %1275 = vmatprep.subr.mxu1 %v2640_v8  ;;  %v2655_v6 = vld [vmem:[#allocation8] sm:$0xff]  ;;  %v2659_v8 = vld [vmem:[#allocation8 + $0x10] sm:$0xff] }
 0x512   :  { %1205 = vmatpush1.msra.mxu0 %v2643_v9  ;;  %1276 = vmatpush1.msra.mxu1 %v2646_v10  ;;  %2923 = vst [vmem:[#allocation37_spill] sm:$0xff] %v2655_v6  ;;  %2924 = vst [vmem:[#allocation39_spill] sm:$0xff] %v2659_v8 }
 0x513   :  { %1206 = vmatprep.subr.mxu0 %v2649_v3  ;;  %1277 = vmatprep.subr.mxu1 %v2652_v11  ;;  %v1001_v3 = vld [vmem:[#allocation2 + $0xa0] sm:$0xff]  ;;  %v1002_v11 = vld [vmem:[#allocation2 + $0xa8] sm:$0xff] }
 0x514   :  { %1207 = vmatpush1.msra.mxu0 %v2655_v6  ;;  %1240 = vmatprep.mubr.f32.mxu0 %v2902_v21 }
 0x515   :  { %1278 = vmatpush1.msra.mxu1 %v2659_v8  ;;  %1311 = vmatprep.mubr.f32.mxu1 %v2902_v21 }
 0x516   :  { %1347 = vmatprep.subr.mxu0 %v2545_v43  ;;  %1418 = vmatprep.subr.mxu1 %v2548_v44 }
 0x5b5   :  { %v1071_v10 = vpop.f32.mrf.mxu0  ;;  %v1142_v9 = vpop.f32.mrf.mxu1 }
 0x5b6   :  { %v1147_v4 = vadd.f32 %v1071_v10, %v1001_v3  ;;  %v1149_v21 = vadd.f32 %v1142_v9, %v1003_v18 }
 0x5b7   :  { %v1073_v2 = vpop.f32.mrf.mxu0  ;;  %v1144_v20 = vpop.f32.mrf.mxu1 }
 0x5b8   :  { %v1151_v45 = vmul.f32 0.5, %v1147_v4  ;;  %v1148_v6 = vadd.f32 %v1073_v2, %v1002_v11  ;;  %v1150_v8 = vadd.f32 %v1144_v20, %v1004_v22  ;;  %v1153_v43 = vmul.f32 0.5, %v1149_v21 }
 0x5ba   :  { %1623 = vtanh.f32 %v1151_v45  ;;  %v1152_v19 = vmul.f32 0.5, %v1148_v6 }
 0x5bc   :  { %1625 = vtanh.f32 %v1152_v19 }
 0x5bd   :  { %1627 = vtanh.f32 %v1150_v8  ;;  %v1343_v8 = vld [vmem:[#allocation2 + $0xe0] sm:$0xff] }
 0x5be   :  { %1629 = vtanh.f32 %v1153_v43 }
 0x5c7   :  { %v1624_v17 = vpop.eup %1623 }
 0x5c8   :  { %v1157_v44 = vadd.f32 1.0, %v1624_v17 }
 0x5c9   :  { %v1626_v16 = vpop.eup %1625 }
 0x5ca   :  { %v1160_v15 = vmul.f32 0.5, %v1157_v44  ;;  %v1158_v14 = vadd.f32 1.0, %v1626_v16  ;;  %v1628_v3 = vpop.eup %1627  ;;  %v1344_v44 = vld [vmem:[#allocation2 + $0xe8] sm:$0xff] }
 0x5cb   :  { %v1630_v19 = vpop.eup %1629 }
 0x5cc   :  { %v1161_v10 = vmul.f32 0.5, %v1158_v14  ;;  %v1165_v4 = vmul.f32 %v1628_v3, %v1160_v15  ;;  %v1159_v20 = vadd.f32 1.0, %v1630_v19 }
 0x5ce   :  { %v1164_v2 = vmul.f32 %v1161_v10, %v2552_v7  ;;  %v1162_v22 = vmul.f32 0.5, %v1159_v20 }
 0x5d0   :  { %v2666_v11 = vadd.f32 %v1165_v4, %v1164_v2 }
 0x5d2   :  { %1631 = vtanh.f32 %v2666_v11 }
 0x5df   :  { %v1632_v18 = vpop.eup %1631 }
 0x5e0   :  { %v1168_v21 = vmul.f32 %v1632_v18, %v1162_v22  ;;  %v1345_v18 = vld [vmem:[#allocation2 + $0xf0] sm:$0xff] }
 0x5e2   :  { %1170 = vst [vmem:[#allocation10 + $0x28] sm:$0xff] %v1168_v21  ;;  %1241 = vmatmul.mubr.f32.vlgmr.msra.gmra.mxu0 %v1168_v21  ;;  %1312 = vmatmul.mubr.f32.vlgmr.msra.gmra.mxu1 %v1168_v21 }
 0x5e3   :  { %1348 = vmatpush1.msra.mxu0 %v2401_v62  ;;  %1419 = vmatpush1.msra.mxu1 %v2404_v55  ;;  %v2925_v62 = vld [vmem:[#allocation22_spill] sm:$0xff]  ;;  %v2926_v55 = vld [vmem:[#allocation21_spill] sm:$0xff] }
 0x5e4   :  { %1349 = vmatprep.subr.mxu0 %v2407_v56  ;;  %1420 = vmatprep.subr.mxu1 %v2410_v49  ;;  %v2927_v56 = vld [vmem:[#allocation24_spill] sm:$0xff]  ;;  %v2928_v49 = vld [vmem:[#allocation23_spill] sm:$0xff] }
 0x5e5   :  { %1350 = vmatpush1.msra.mxu0 %v2413_v0  ;;  %1421 = vmatpush1.msra.mxu1 %v2416_v58  ;;  %v2929_v0 = vld [vmem:[#allocation26_spill] sm:$0xff]  ;;  %v2930_v58 = vld [vmem:[#allocation25_spill] sm:$0xff] }
 0x5e6   :  { %1351 = vmatprep.subr.mxu0 %v2419_v50  ;;  %1422 = vmatprep.subr.mxu1 %v2422_v47  ;;  %v2931_v50 = vld [vmem:[#allocation28_spill] sm:$0xff]  ;;  %v2932_v47 = vld [vmem:[#allocation27_spill] sm:$0xff] }
 0x5e7   :  { %1352 = vmatpush1.msra.mxu0 %v2425_v54  ;;  %1423 = vmatpush1.msra.mxu1 %v2428_v23  ;;  %v2933_v54 = vld [vmem:[#allocation30_spill] sm:$0xff]  ;;  %v2934_v23 = vld [vmem:[#allocation29_spill] sm:$0xff] }
 0x5e8   :  { %1353 = vmatprep.subr.mxu0 %v2431_v24  ;;  %1424 = vmatprep.subr.mxu1 %v2434_v25  ;;  %v2935_v24 = vld [vmem:[#allocation32_spill] sm:$0xff]  ;;  %v2936_v25 = vld [vmem:[#allocation31_spill] sm:$0xff] }
 0x5e9   :  { %1354 = vmatpush1.msra.mxu0 %v2437_v26  ;;  %1425 = vmatpush1.msra.mxu1 %v2440_v27  ;;  %v2937_v26 = vld [vmem:[#allocation34_spill] sm:$0xff]  ;;  %v2938_v27 = vld [vmem:[#allocation33_spill] sm:$0xff] }
 0x5ea   :  { %1355 = vmatprep.subr.mxu0 %v2443_v28  ;;  %1426 = vmatprep.subr.mxu1 %v2446_v29  ;;  %v2939_v28 = vld [vmem:[#allocation36_spill] sm:$0xff]  ;;  %v2940_v29 = vld [vmem:[#allocation35_spill] sm:$0xff] }
 0x5eb   :  { %1356 = vmatpush1.msra.mxu0 %v2449_v30  ;;  %1427 = vmatpush1.msra.mxu1 %v2452_v31  ;;  %v2941_v30 = vld [vmem:[#allocation38_spill] sm:$0xff]  ;;  %v2942_v31 = vld [vmem:[#allocation37_spill] sm:$0xff] }
 0x5ec   :  { %1357 = vmatprep.subr.mxu0 %v2455_v32  ;;  %1428 = vmatprep.subr.mxu1 %v2458_v33  ;;  %v2943_v32 = vmov 0.0   ;;  %v2944_v33 = vld [vmem:[#allocation39_spill] sm:$0xff] }
 0x5ed   :  { %1358 = vmatpush1.msra.mxu0 %v2461_v34  ;;  %1429 = vmatpush1.msra.mxu1 %v2464_v35  ;;  %v1172_v34 = vld [vmem:[#allocation2 + $0xc0] sm:$0xff] }
 0x5ee   :  { %1359 = vmatprep.subr.mxu0 %v2467_v36  ;;  %1430 = vmatprep.subr.mxu1 %v2470_v37  ;;  %v1173_v37 = vld [vmem:[#allocation2 + $0xc8] sm:$0xff] }
 0x5ef   :  { %1360 = vmatpush1.msra.mxu0 %v2473_v38  ;;  %1431 = vmatpush1.msra.mxu1 %v2476_v39 }
 0x5f0   :  { %1361 = vmatprep.subr.mxu0 %v2479_v40  ;;  %1432 = vmatprep.subr.mxu1 %v2482_v41 }
 0x5f1   :  { %1362 = vmatpush1.msra.mxu0 %v2485_v42  ;;  %1433 = vmatpush1.msra.mxu1 %v2488_v53  ;;  %v1175_v42 = vld [vmem:[#allocation2 + $0xd8] sm:$0xff] }
 0x5f2   :  { %1363 = vmatprep.subr.mxu0 %v2491_v60  ;;  %1434 = vmatprep.subr.mxu1 %v2494_v1 }
 0x5f3   :  { %1364 = vmatpush1.msra.mxu0 %v2497_v5  ;;  %1435 = vmatpush1.msra.mxu1 %v2500_v46  ;;  %v1174_v5 = vld [vmem:[#allocation2 + $0xd0] sm:$0xff] }
 0x5f4   :  { %1365 = vmatprep.subr.mxu0 %v2503_v52  ;;  %1436 = vmatprep.subr.mxu1 %v2506_v51 }
 0x5f5   :  { %1366 = vmatpush1.msra.mxu0 %v2509_v57  ;;  %1437 = vmatpush1.msra.mxu1 %v2512_v48 }
 0x5f6   :  { %1367 = vmatprep.subr.mxu0 %v2515_v63  ;;  %1438 = vmatprep.subr.mxu1 %v2594_v59 }
 0x5f7   :  { %1368 = vmatpush1.msra.mxu0 %v2519_v61  ;;  %1439 = vmatpush1.msra.mxu1 %v2598_v12 }
 0x5f8   :  { %1369 = vmatprep.subr.mxu0 %v2601_v13  ;;  %1440 = vmatprep.subr.mxu1 %v2925_v62 }
 0x5f9   :  { %1370 = vmatpush1.msra.mxu0 %v2926_v55  ;;  %1441 = vmatpush1.msra.mxu1 %v2927_v56 }
 0x5fa   :  { %1371 = vmatprep.subr.mxu0 %v2928_v49  ;;  %1442 = vmatprep.subr.mxu1 %v2929_v0 }
 0x5fb   :  { %1372 = vmatpush1.msra.mxu0 %v2930_v58  ;;  %1443 = vmatpush1.msra.mxu1 %v2931_v50 }
 0x5fc   :  { %1373 = vmatprep.subr.mxu0 %v2932_v47  ;;  %1444 = vmatprep.subr.mxu1 %v2933_v54 }
 0x5fd   :  { %1374 = vmatpush1.msra.mxu0 %v2934_v23  ;;  %1445 = vmatpush1.msra.mxu1 %v2935_v24 }
 0x5fe   :  { %1375 = vmatprep.subr.mxu0 %v2936_v25  ;;  %1446 = vmatprep.subr.mxu1 %v2937_v26 }
 0x5ff   :  { %1376 = vmatpush1.msra.mxu0 %v2938_v27  ;;  %1447 = vmatpush1.msra.mxu1 %v2939_v28 }
 0x600   :  { %1377 = vmatprep.subr.mxu0 %v2940_v29  ;;  %1448 = vmatprep.subr.mxu1 %v2941_v30 }
 0x601   :  { %1378 = vmatpush1.msra.mxu0 %v2942_v31  ;;  %1411 = vmatprep.mubr.f32.mxu0 %v2943_v32 }
 0x602   :  { %1449 = vmatpush1.msra.mxu1 %v2944_v33  ;;  %1482 = vmatprep.mubr.f32.mxu1 %v2943_v32 }
 0x6a2   :  { %v1242_v35 = vpop.f32.mrf.mxu0  ;;  %v1313_v36 = vpop.f32.mrf.mxu1 }
 0x6a3   :  { %v1318_v38 = vadd.f32 %v1242_v35, %v1172_v34  ;;  %v1320_v46 = vadd.f32 %v1313_v36, %v1174_v5 }
 0x6a4   :  { %v1244_v39 = vpop.f32.mrf.mxu0  ;;  %v1315_v53 = vpop.f32.mrf.mxu1 }
 0x6a5   :  { %v1322_v40 = vmul.f32 0.5, %v1318_v38  ;;  %v1319_v41 = vadd.f32 %v1244_v39, %v1173_v37  ;;  %v1321_v1 = vadd.f32 %v1315_v53, %v1175_v42  ;;  %v1324_v52 = vmul.f32 0.5, %v1320_v46 }
 0x6a7   :  { %1633 = vtanh.f32 %v1322_v40  ;;  %v1323_v60 = vmul.f32 0.5, %v1319_v41 }
 0x6a9   :  { %1635 = vtanh.f32 %v1323_v60 }
 0x6aa   :  { %1637 = vtanh.f32 %v1321_v1 }
 0x6ab   :  { %1639 = vtanh.f32 %v1324_v52 }
 0x6b4   :  { %v1634_v51 = vpop.eup %1633 }
 0x6b5   :  { %v1328_v57 = vadd.f32 1.0, %v1634_v51 }
 0x6b6   :  { %v1636_v48 = vpop.eup %1635 }
 0x6b7   :  { %v1331_v63 = vmul.f32 0.5, %v1328_v57  ;;  %v1329_v61 = vadd.f32 1.0, %v1636_v48  ;;  %v1638_v59 = vpop.eup %1637 }
 0x6b8   :  { %v1640_v15 = vpop.eup %1639 }
 0x6b9   :  { %v1332_v7 = vmul.f32 0.5, %v1329_v61  ;;  %v1336_v13 = vmul.f32 %v1638_v59, %v1331_v63  ;;  %v1330_v16 = vadd.f32 1.0, %v1640_v15 }
 0x6bb   :  { %v1335_v12 = vmul.f32 %v1332_v7, %v2666_v11  ;;  %v1333_v17 = vmul.f32 0.5, %v1330_v16  ;;  %v1346_v11 = vld [vmem:[#allocation2 + $0xf8] sm:$0xff] }
 0x6bd   :  { %v1337_v14 = vadd.f32 %v1336_v13, %v1335_v12 }
 0x6bf   :  { %1641 = vtanh.f32 %v1337_v14 }
 0x6cc   :  { %v1642_v45 = vpop.eup %1641 }
 0x6cd   :  { %v1339_v6 = vmul.f32 %v1642_v45, %v1333_v17 }
 0x6cf   :  { %1341 = vst [vmem:[#allocation10 + $0x30] sm:$0xff] %v1339_v6  ;;  %1412 = vmatmul.mubr.f32.vlgmr.msra.gmra.mxu0 %v1339_v6  ;;  %1483 = vmatmul.mubr.f32.vlgmr.msra.gmra.mxu1 %v1339_v6 }
 0x78f   :  { %v1413_v9 = vpop.f32.mrf.mxu0  ;;  %v1484_v43 = vpop.f32.mrf.mxu1 }
 0x790   :  { %v1489_v10 = vadd.f32 %v1413_v9, %v1343_v8  ;;  %v1491_v21 = vadd.f32 %v1484_v43, %v1345_v18 }
 0x791   :  { %v1415_v3 = vpop.f32.mrf.mxu0  ;;  %v1486_v19 = vpop.f32.mrf.mxu1 }
 0x792   :  { %v1493_v2 = vmul.f32 0.5, %v1489_v10  ;;  %v1490_v4 = vadd.f32 %v1415_v3, %v1344_v44  ;;  %v1492_v22 = vadd.f32 %v1486_v19, %v1346_v11  ;;  %v1495_v62 = vmul.f32 0.5, %v1491_v21 }
 0x794   :  { %1643 = vtanh.f32 %v1493_v2  ;;  %v1494_v20 = vmul.f32 0.5, %v1490_v4 }
 0x796   :  { %1645 = vtanh.f32 %v1494_v20 }
 0x797   :  { %1647 = vtanh.f32 %v1492_v22 }
 0x798   :  { %1649 = vtanh.f32 %v1495_v62 }
 0x7a1   :  { %v1644_v55 = vpop.eup %1643 }
 0x7a2   :  { %v1499_v56 = vadd.f32 1.0, %v1644_v55 }
 0x7a3   :  { %v1646_v49 = vpop.eup %1645 }
 0x7a4   :  { %v1502_v0 = vmul.f32 0.5, %v1499_v56  ;;  %v1500_v58 = vadd.f32 1.0, %v1646_v49  ;;  %v1648_v47 = vpop.eup %1647 }
 0x7a5   :  { %v1650_v25 = vpop.eup %1649 }
 0x7a6   :  { %v1503_v50 = vmul.f32 0.5, %v1500_v58  ;;  %v1507_v23 = vmul.f32 %v1648_v47, %v1502_v0  ;;  %v1501_v26 = vadd.f32 1.0, %v1650_v25 }
 0x7a8   :  { %v1506_v54 = vmul.f32 %v1503_v50, %v1337_v14  ;;  %v1504_v27 = vmul.f32 0.5, %v1501_v26 }
 0x7aa   :  { %v1508_v24 = vadd.f32 %v1507_v23, %v1506_v54 }
 0x7ac   :  { %1651 = vtanh.f32 %v1508_v24  ;;  %1514 = vst [vmem:[#allocation13] sm:$0xff] %v1508_v24 }
 0x7b9   :  { %v1652_v28 = vpop.eup %1651 }
 0x7ba   :  { %v1510_v29 = vmul.f32 %v1652_v28, %v1504_v27 }
 0x7bc   :  { %1512 = vst [vmem:[#allocation10 + $0x38] sm:$0xff] %v1510_v29  ;;  %1513 = vst [vmem:[#allocation11] sm:$0xff] %v1510_v29 }
 0x7bd   :  { %1808 = shalt.err (!%p1805_p10)
}
 0x7be   :  { %1536 = dma.vmem_to_hbm [thread:$0]  %s1534_s3, 128, %s2748_s5, [#allocation12]  }
 0x7bf   :  { %s1817_s24 = scalar_lea.vmem %s1521_s18, 1024  ;;  %p1822_p12 = scmp.lt.s32.totalorder %s1521_s18, %s1521_s18 }
 0x7c0   :  { %p1818_p11 = scmp.ne.s32.totalorder %s1521_s18, %s1817_s24  ;;  %p1823_p13 = scmp.lt.s32.totalorder %s1817_s24, %s1817_s24 }
 0x7c2   :  { %p1824_p0 = por %p1823_p13, %p1822_p12 }
 0x7c4   :  { %p1825_p1 = pnand %p1824_p0, %p1818_p11 }
 0x7c6   :  { %1828 = shalt.err (!%p1825_p1)
}
 0x7c7   :  { %s1877_s25 = smov 128   ;;  %s1878_s26 = smov 8  }
 0x7c8   :  { %1526 = dma.vmem_to_hbm [thread:$0]  %s1521_s18, 1024, %s2747_s4, [#allocation4], %s1877_s25, %s1877_s25, %s1878_s26  }
 0x7c9   :  { %s1837_s29 = scalar_lea.vmem %s1544_s20, 128  ;;  %p1842_p3 = scmp.lt.s32.totalorder %s1544_s20, %s1544_s20 }
 0x7ca   :  { %p1838_p2 = scmp.ne.s32.totalorder %s1544_s20, %s1837_s29  ;;  %p1843_p4 = scmp.lt.s32.totalorder %s1837_s29, %s1837_s29 }
 0x7cc   :  { %p1844_p5 = por %p1843_p4, %p1842_p3 }
 0x7ce   :  { %p1845_p6 = pnand %p1844_p5, %p1838_p2 }
 0x7d0   :  { %1848 = shalt.err (!%p1845_p6)
}
 0x7d1   :  { %1546 = dma.vmem_to_hbm [thread:$0]  %s1544_s20, 128, %s2749_s6, [#allocation12]  }
 0x7d2   :  { %1863 = dma.done.wait [#allocation4], 1024  }
 0x7d3   :  { %1864 = vsyncadd [#allocation4], 4294966272 }
 0x7d4   :  { %1865 = dma.done.wait [#allocation12], 256  }
 0x7d5   :  { %1866 = vsyncadd [#allocation12], 4294967040 }
 0x7d6   :  { %1556 = vsyncpa [#allocation3], 1 }
 0x7d7   :  { %1557 = vsyncpa [#allocation6], 1 }
 0x7d8   :  { %1558 = vsyncpa [#allocation9], 1 }
 0x7d9   :  { %1559 = vsyncpa [#allocation4], 1 }
 0x7da   :  { %1560 = vsyncpa [#allocation12], 1 }

</bundles_post_ra>
